<compile_context>
chip_gen: v7x
topology: tpu7x:2x2x1
jax: 0.10.0
libtpu: 0.0.40
codegen_flags: <defaults>
</compile_context>

<pallas_src>
import jax
import jax.numpy as jnp
from jax import lax
from jax.experimental import pallas as pl
from jax.experimental.pallas import tpu as pltpu

_HIGHEST = lax.Precision.HIGHEST


def _round_up(n, m):
    return ((n + m - 1) // m) * m


def make_attn_kernel(B, S, E, SP, EP, inv_scale):
    """B/S/E: logical sizes. SP: sublane-padded rows (8 for f32). EP: lane-padded embed."""

    def attn_kernel(x_ref, wq_ref, bq_ref, wk_ref, bk_ref, wv_ref, bv_ref,
                    out_ref, attn_ref):
        x = x_ref[...]                                            # (B*SP, EP)

        # Q/K/V projections for every (batch, position) row at once — one MXU
        # matmul each.  1/sqrt(E) is folded into q (touches S*E elems, not S*S).
        q = (jnp.dot(x, wq_ref[...], preferred_element_type=jnp.float32,
                     precision=_HIGHEST) + bq_ref[...]) * inv_scale
        k = jnp.dot(x, wk_ref[...], preferred_element_type=jnp.float32,
                    precision=_HIGHEST) + bk_ref[...]
        v = jnp.dot(x, wv_ref[...], preferred_element_type=jnp.float32,
                    precision=_HIGHEST) + bv_ref[...]

        # Single-vreg row mask for the zero-padded key rows (broadcasts in where).
        key_valid = lax.broadcasted_iota(jnp.int32, (1, SP), 1) < S

        for b in range(B):        # static unroll; SP=8 keeps live values tiny
            lo = b * SP
            qb = q[lo:lo + SP]
            kb = k[lo:lo + SP]
            vb = v[lo:lo + SP]

            # scores = q @ k^T expressed as a contraction over the embed axis
            # (no explicit transpose of k -> no XLU transpose / VMEM copy).
            s = lax.dot_general(qb, kb, (((1,), (1,)), ((), ())),
                                precision=_HIGHEST,
                                preferred_element_type=jnp.float32)   # (SP, SP)
            s = jnp.where(key_valid, s, -1e30)

            # Numerically stable softmax over keys, f32 throughout.  Exact
            # divide: the denominator is one sublane column per row, so the
            # approximate EUP reciprocal buys nothing here and the exact
            # divide keeps agreement with the reference at ~1e-6.
            m = jnp.max(s, axis=-1, keepdims=True)
            e = jnp.exp(s - m)
            w = e / jnp.sum(e, axis=-1, keepdims=True)

            o = jnp.dot(w, vb, preferred_element_type=jnp.float32,
                        precision=_HIGHEST)

            # Store at the true (un-padded) shapes; padded query rows / embed
            # columns are simply never written.
            out_ref[b] = o[:S, :E]
            attn_ref[b] = w[:S, :S]

    return attn_kernel


def prepare_params(wq_t, bq, wk_t, bk, wv_t, bv):
    """Pad nn.Linear params to lane-dense EP once, at parameter-load time."""
    E = wq_t.shape[0]
    EP = _round_up(E, 128)
    pad_w = ((0, EP - E), (0, EP - E))
    pad_b = ((0, 0), (0, EP - E))
    return (jnp.pad(wq_t, pad_w), jnp.pad(bq, pad_b),
            jnp.pad(wk_t, pad_w), jnp.pad(bk, pad_b),
            jnp.pad(wv_t, pad_w), jnp.pad(bv, pad_b))


@jax.jit
def self_attention_nn(x, wq_p, bq_p, wk_p, bk_p, wv_p, bv_p):
    """x: (B, S, E) f32.  w*_p: pre-padded (EP, EP); b*_p: pre-padded (1, EP)."""
    B, S, E = x.shape
    EP = wq_p.shape[0]          # lane-dense embed width (128 for E=8)
    SP = _round_up(S, 8)        # f32 sublane minimum — NOT 128
    inv_scale = 1.0 / (float(E) ** 0.5)

    # Only x is padded per call.  Padded rows/cols are zeros; padded key rows
    # are masked in-kernel and padded query rows are never stored.
    x_p = jnp.pad(x, ((0, 0), (0, SP - S), (0, EP - E))).reshape(B * SP, EP)

    kernel = make_attn_kernel(B, S, E, SP, EP, inv_scale)

    x_spec = pl.BlockSpec((B * SP, EP), lambda i: (0, 0))
    w_spec = pl.BlockSpec((EP, EP), lambda i: (0, 0))
    b_spec = pl.BlockSpec((1, EP), lambda i: (0, 0))

    out, attn = pl.pallas_call(
        kernel,
        out_shape=(
            jax.ShapeDtypeStruct((B, S, E), jnp.float32),
            jax.ShapeDtypeStruct((B, S, S), jnp.float32),
        ),
        grid_spec=pltpu.PrefetchScalarGridSpec(
            num_scalar_prefetch=0,
            grid=(1,),                      # whole problem in one invocation
            in_specs=[x_spec,
                      w_spec, b_spec,       # Wq, bq
                      w_spec, b_spec,       # Wk, bk
                      w_spec, b_spec],      # Wv, bv
            out_specs=(
                # block_shape == full array dims: legal and skips the (8,128)
                # divisibility rule, so outputs keep their true shapes.
                pl.BlockSpec((B, S, E), lambda i: (0, 0, 0)),   # output
                pl.BlockSpec((B, S, S), lambda i: (0, 0, 0)),   # attention_weights
            ),
        ),
        compiler_params=pltpu.CompilerParams(
            dimension_semantics=("arbitrary",)),
    )(x_p, wq_p, bq_p, wk_p, bk_p, wv_p, bv_p)
    return out, attn


def reference(x, wq_t, bq, wk_t, bk, wv_t, bv):
    E = x.shape[-1]
    q = jnp.dot(x, wq_t, precision=_HIGHEST) + bq
    k = jnp.dot(x, wk_t, precision=_HIGHEST) + bk
    v = jnp.dot(x, wv_t, precision=_HIGHEST) + bv
    scores = jnp.einsum("bse,bte->bst", q, k, precision=_HIGHEST) / (float(E) ** 0.5)
    w = jax.nn.softmax(scores, axis=-1)
    return jnp.einsum("bst,bte->bse", w, v, precision=_HIGHEST), w


def _run_case(key, B, S, E):
    kx, kq, kbq, kk, kbk, kv, kbv = jax.random.split(key, 7)
    x = jax.random.normal(kx, (B, S, E), jnp.float32)

    # nn.Linear(E, E) params: weight (E_out, E_in), bias (E_out).  We store the
    # transposed weight (E_in, E_out) for the kernel.
    wq_t = jax.random.normal(kq, (E, E), jnp.float32) * 0.1
    bq = jax.random.normal(kbq, (1, E), jnp.float32) * 0.1
    wk_t = jax.random.normal(kk, (E, E), jnp.float32) * 0.1
    bk = jax.random.normal(kbk, (1, E), jnp.float32) * 0.1
    wv_t = jax.random.normal(kv, (E, E), jnp.float32) * 0.1
    bv = jax.random.normal(kbv, (1, E), jnp.float32) * 0.1

    # Padding of params happens once, outside the per-call path.
    params_p = prepare_params(wq_t, bq, wk_t, bk, wv_t, bv)

    out, attn = self_attention_nn(x, *params_p)
    out = jax.block_until_ready(out)
    attn = jax.block_until_ready(attn)

    out_ref, attn_ref = reference(x, wq_t, bq, wk_t, bk, wv_t, bv)
    assert out.shape == (B, S, E)
    assert attn.shape == (B, S, S)
    # Exact softmax divide + HIGHEST-precision matmuls -> agreement is ~1e-6;
    # 1e-4 here is just margin.
    assert jnp.allclose(out, out_ref, atol=1e-4, rtol=1e-4)
    assert jnp.allclose(attn, attn_ref, atol=1e-4, rtol=1e-4)
    assert jnp.allclose(jnp.sum(attn, axis=-1), 1.0, atol=1e-4)


if __name__ == "__main__":
    batch_size, seq_len, embedding_dim = 1, 4, 8
    key = jax.random.PRNGKey(0)
    k1, k2 = jax.random.split(key)
    _run_case(k1, batch_size, seq_len, embedding_dim)   # the module's spec shapes
    _run_case(k2, 2, seq_len, embedding_dim)            # batched sanity check
    print("KERNEL_OK")
</pallas_src>

<mosaic_0001>
module attributes {stable_mosaic.version = 11 : i64} {
  func.func @attn_kernel(%arg0: i32, %arg1: memref<8x128xf32, #tpu.memory_space<vmem>>, %arg2: memref<128x128xf32, #tpu.memory_space<vmem>>, %arg3: memref<1x128xf32, #tpu.memory_space<vmem>>, %arg4: memref<128x128xf32, #tpu.memory_space<vmem>>, %arg5: memref<1x128xf32, #tpu.memory_space<vmem>>, %arg6: memref<128x128xf32, #tpu.memory_space<vmem>>, %arg7: memref<1x128xf32, #tpu.memory_space<vmem>>, %arg8: memref<1x4x8xf32, #tpu.memory_space<vmem>>, %arg9: memref<1x4x4xf32, #tpu.memory_space<vmem>>) attributes {dimension_semantics = [#tpu.dimension_semantics<arbitrary>], iteration_bounds = array<i64: 1>, scalar_prefetch = 0 : i64, scratch_operands = 0 : i64, tpu.core_type = #tpu.core_type<tc>, window_params = [{pipeline_mode = #tpu.pipeline_mode<synchronous>, transform_indices = @transform_0, window_bounds = array<i64: 8, 128>}, {pipeline_mode = #tpu.pipeline_mode<synchronous>, transform_indices = @transform_1, window_bounds = array<i64: 128, 128>}, {pipeline_mode = #tpu.pipeline_mode<synchronous>, transform_indices = @transform_2, window_bounds = array<i64: 1, 128>}, {pipeline_mode = #tpu.pipeline_mode<synchronous>, transform_indices = @transform_3, window_bounds = array<i64: 128, 128>}, {pipeline_mode = #tpu.pipeline_mode<synchronous>, transform_indices = @transform_4, window_bounds = array<i64: 1, 128>}, {pipeline_mode = #tpu.pipeline_mode<synchronous>, transform_indices = @transform_5, window_bounds = array<i64: 128, 128>}, {pipeline_mode = #tpu.pipeline_mode<synchronous>, transform_indices = @transform_6, window_bounds = array<i64: 1, 128>}, {pipeline_mode = #tpu.pipeline_mode<synchronous>, transform_indices = @transform_7, window_bounds = array<i64: 1, 4, 8>}, {pipeline_mode = #tpu.pipeline_mode<synchronous>, transform_indices = @transform_8, window_bounds = array<i64: 1, 4, 4>}]} {
    %c0 = arith.constant 0 : index
    %c0_0 = arith.constant 0 : index
    %0 = vector.load %arg1[%c0, %c0_0] : memref<8x128xf32, #tpu.memory_space<vmem>>, vector<8x128xf32>
    %c0_1 = arith.constant 0 : index
    %c0_2 = arith.constant 0 : index
    %1 = vector.load %arg2[%c0_1, %c0_2] : memref<128x128xf32, #tpu.memory_space<vmem>>, vector<128x128xf32>
    %cst = arith.constant dense<0.000000e+00> : vector<8x128xf32>
    %2 = tpu.matmul %0, %1, %cst {dimension_numbers = #tpu.dot_dimension_numbers<[1], [0], [0], [1], [0, 0, 1, 1], [], []>, precision = #tpu.contract_precision<fp32>} : vector<8x128xf32>, vector<128x128xf32>, vector<8x128xf32> -> vector<8x128xf32>
    %c0_3 = arith.constant 0 : index
    %c0_4 = arith.constant 0 : index
    %3 = vector.load %arg3[%c0_3, %c0_4] : memref<1x128xf32, #tpu.memory_space<vmem>>, vector<1x128xf32>
    %4 = vector.broadcast %3 : vector<1x128xf32> to vector<8x128xf32>
    %5 = arith.addf %2, %4 : vector<8x128xf32>
    %cst_5 = arith.constant 0.353553385 : f32
    %6 = vector.broadcast %cst_5 : f32 to vector<8x128xf32>
    %7 = arith.mulf %5, %6 : vector<8x128xf32>
    %c0_6 = arith.constant 0 : index
    %c0_7 = arith.constant 0 : index
    %8 = vector.load %arg4[%c0_6, %c0_7] : memref<128x128xf32, #tpu.memory_space<vmem>>, vector<128x128xf32>
    %cst_8 = arith.constant dense<0.000000e+00> : vector<8x128xf32>
    %9 = tpu.matmul %0, %8, %cst_8 {dimension_numbers = #tpu.dot_dimension_numbers<[1], [0], [0], [1], [0, 0, 1, 1], [], []>, precision = #tpu.contract_precision<fp32>} : vector<8x128xf32>, vector<128x128xf32>, vector<8x128xf32> -> vector<8x128xf32>
    %c0_9 = arith.constant 0 : index
    %c0_10 = arith.constant 0 : index
    %10 = vector.load %arg5[%c0_9, %c0_10] : memref<1x128xf32, #tpu.memory_space<vmem>>, vector<1x128xf32>
    %11 = vector.broadcast %10 : vector<1x128xf32> to vector<8x128xf32>
    %12 = arith.addf %9, %11 : vector<8x128xf32>
    %c0_11 = arith.constant 0 : index
    %c0_12 = arith.constant 0 : index
    %13 = vector.load %arg6[%c0_11, %c0_12] : memref<128x128xf32, #tpu.memory_space<vmem>>, vector<128x128xf32>
    %cst_13 = arith.constant dense<0.000000e+00> : vector<8x128xf32>
    %14 = tpu.matmul %0, %13, %cst_13 {dimension_numbers = #tpu.dot_dimension_numbers<[1], [0], [0], [1], [0, 0, 1, 1], [], []>, precision = #tpu.contract_precision<fp32>} : vector<8x128xf32>, vector<128x128xf32>, vector<8x128xf32> -> vector<8x128xf32>
    %c0_14 = arith.constant 0 : index
    %c0_15 = arith.constant 0 : index
    %15 = vector.load %arg7[%c0_14, %c0_15] : memref<1x128xf32, #tpu.memory_space<vmem>>, vector<1x128xf32>
    %16 = vector.broadcast %15 : vector<1x128xf32> to vector<8x128xf32>
    %17 = arith.addf %14, %16 : vector<8x128xf32>
    %18 = tpu.iota {dimensions = array<i32: 1>} : vector<1x8xi32>
    %c4_i32 = arith.constant 4 : i32
    %19 = vector.broadcast %c4_i32 : i32 to vector<1x8xi32>
    %20 = arith.cmpi slt, %18, %19 : vector<1x8xi32>
    %cst_16 = arith.constant dense<0.000000e+00> : vector<8x8xf32>
    %21 = tpu.matmul %7, %12, %cst_16 {dimension_numbers = #tpu.dot_dimension_numbers<[1], [1], [0], [0], [0, 0, 1, 0], [], []>, precision = #tpu.contract_precision<fp32>} : vector<8x128xf32>, vector<8x128xf32>, vector<8x8xf32> -> vector<8x8xf32>
    %cst_17 = arith.constant -1.000000e+30 : f32
    %22 = vector.shape_cast %20 : vector<1x8xi1> to vector<1x8xi1>
    %23 = vector.broadcast %22 : vector<1x8xi1> to vector<8x8xi1>
    %24 = vector.broadcast %cst_17 : f32 to vector<8x8xf32>
    %25 = arith.select %23, %21, %24 : vector<8x8xi1>, vector<8x8xf32>
    %cst_18 = arith.constant dense<0xFF800000> : vector<8xf32>
    %26 = vector.multi_reduction <maximumf>, %25, %cst_18 [1] : vector<8x8xf32> to vector<8xf32>
    %27 = vector.shape_cast %26 : vector<8xf32> to vector<8x1xf32>
    %28 = vector.broadcast %27 : vector<8x1xf32> to vector<8x8xf32>
    %29 = arith.subf %25, %28 : vector<8x8xf32>
    %30 = math.exp %29 : vector<8x8xf32>
    %cst_19 = arith.constant dense<0.000000e+00> : vector<8xf32>
    %31 = vector.multi_reduction <add>, %30, %cst_19 [1] : vector<8x8xf32> to vector<8xf32>
    %32 = vector.shape_cast %31 : vector<8xf32> to vector<8x1xf32>
    %33 = vector.broadcast %32 : vector<8x1xf32> to vector<8x8xf32>
    %34 = arith.divf %30, %33 : vector<8x8xf32>
    %cst_20 = arith.constant dense<0.000000e+00> : vector<8x128xf32>
    %35 = tpu.matmul %34, %17, %cst_20 {dimension_numbers = #tpu.dot_dimension_numbers<[1], [0], [0], [1], [0, 0, 1, 1], [], []>, precision = #tpu.contract_precision<fp32>} : vector<8x8xf32>, vector<8x128xf32>, vector<8x128xf32> -> vector<8x128xf32>
    %36 = vector.extract_strided_slice %35 {offsets = [0, 0], sizes = [4, 8], strides = [1, 1]} : vector<8x128xf32> to vector<4x8xf32>
    %c0_21 = arith.constant 0 : index
    %c0_22 = arith.constant 0 : index
    %c0_23 = arith.constant 0 : index
    %37 = vector.load %arg8[%c0_21, %c0_22, %c0_23] : memref<1x4x8xf32, #tpu.memory_space<vmem>>, vector<1x4x8xf32>
    %38 = vector.shape_cast %37 : vector<1x4x8xf32> to vector<4x8xf32>
    %39 = vector.shape_cast %36 : vector<4x8xf32> to vector<1x4x8xf32>
    tpu.vector_store %arg8[%c0_21, %c0_22, %c0_23], %39 {strides = array<i32>} : memref<1x4x8xf32, #tpu.memory_space<vmem>>, vector<1x4x8xf32>,
    %40 = vector.extract_strided_slice %34 {offsets = [0, 0], sizes = [4, 4], strides = [1, 1]} : vector<8x8xf32> to vector<4x4xf32>
    %c0_24 = arith.constant 0 : index
    %c0_25 = arith.constant 0 : index
    %c0_26 = arith.constant 0 : index
    %41 = vector.load %arg9[%c0_24, %c0_25, %c0_26] : memref<1x4x4xf32, #tpu.memory_space<vmem>>, vector<1x4x4xf32>
    %42 = vector.shape_cast %41 : vector<1x4x4xf32> to vector<4x4xf32>
    %43 = vector.shape_cast %40 : vector<4x4xf32> to vector<1x4x4xf32>
    tpu.vector_store %arg9[%c0_24, %c0_25, %c0_26], %43 {strides = array<i32>} : memref<1x4x4xf32, #tpu.memory_space<vmem>>, vector<1x4x4xf32>,
    return
  }
  func.func @transform_0(%arg0: i32) -> (i32, i32) {
    %c0_i32 = arith.constant 0 : i32
    %c0_i32_0 = arith.constant 0 : i32
    %c0_i32_1 = arith.constant 0 : i32
    return %c0_i32, %c0_i32_0 : i32, i32
  }
  func.func @transform_1(%arg0: i32) -> (i32, i32) {
    %c0_i32 = arith.constant 0 : i32
    %c0_i32_0 = arith.constant 0 : i32
    %c0_i32_1 = arith.constant 0 : i32
    return %c0_i32, %c0_i32_0 : i32, i32
  }
  func.func @transform_2(%arg0: i32) -> (i32, i32) {
    %c0_i32 = arith.constant 0 : i32
    %c0_i32_0 = arith.constant 0 : i32
    %c0_i32_1 = arith.constant 0 : i32
    return %c0_i32, %c0_i32_0 : i32, i32
  }
  func.func @transform_3(%arg0: i32) -> (i32, i32) {
    %c0_i32 = arith.constant 0 : i32
    %c0_i32_0 = arith.constant 0 : i32
    %c0_i32_1 = arith.constant 0 : i32
    return %c0_i32, %c0_i32_0 : i32, i32
  }
  func.func @transform_4(%arg0: i32) -> (i32, i32) {
    %c0_i32 = arith.constant 0 : i32
    %c0_i32_0 = arith.constant 0 : i32
    %c0_i32_1 = arith.constant 0 : i32
    return %c0_i32, %c0_i32_0 : i32, i32
  }
  func.func @transform_5(%arg0: i32) -> (i32, i32) {
    %c0_i32 = arith.constant 0 : i32
    %c0_i32_0 = arith.constant 0 : i32
    %c0_i32_1 = arith.constant 0 : i32
    return %c0_i32, %c0_i32_0 : i32, i32
  }
  func.func @transform_6(%arg0: i32) -> (i32, i32) {
    %c0_i32 = arith.constant 0 : i32
    %c0_i32_0 = arith.constant 0 : i32
    %c0_i32_1 = arith.constant 0 : i32
    return %c0_i32, %c0_i32_0 : i32, i32
  }
  func.func @transform_7(%arg0: i32) -> (i32, i32, i32) {
    %c0_i32 = arith.constant 0 : i32
    %c0_i32_0 = arith.constant 0 : i32
    %c0_i32_1 = arith.constant 0 : i32
    %c0_i32_2 = arith.constant 0 : i32
    return %c0_i32, %c0_i32_0, %c0_i32_1 : i32, i32, i32
  }
  func.func @transform_8(%arg0: i32) -> (i32, i32, i32) {
    %c0_i32 = arith.constant 0 : i32
    %c0_i32_0 = arith.constant 0 : i32
    %c0_i32_1 = arith.constant 0 : i32
    %c0_i32_2 = arith.constant 0 : i32
    return %c0_i32, %c0_i32_0, %c0_i32_1 : i32, i32, i32
  }
}

</mosaic_0001>

<bundles_post_ra>
// kernel: self_attention_nn.1
= control target key start
LH: loop header
LB: loop body
LE: loop exit
PB: predicated region body
PF: predicated region fallthrough
CT: control target
= control target key end

     0   :  { %14 = vsyncpa [#allocation3], 0  ;;  %s5596_s0 = inlined_call_operand.vmem [shape: f32[8,128], index: 0, kind: input, shape index: {}]   ;;  %s5597_s1 = inlined_call_operand.hbm [shape: f32[128,128], index: 1, kind: input, shape index: {}]   ;;  %s5598_s2 = inlined_call_operand.vmem [shape: f32[1,128], index: 2, kind: input, shape index: {}]   ;;  %s5599_s3 = inlined_call_operand.hbm [shape: f32[128,128], index: 3, kind: input, shape index: {}]   ;;  %s5600_s4 = inlined_call_operand.vmem [shape: f32[1,128], index: 4, kind: input, shape index: {}]   ;;  %s5601_s5 = inlined_call_operand.hbm [shape: f32[128,128], index: 5, kind: input, shape index: {}]   ;;  %s5602_s6 = inlined_call_operand.vmem [shape: f32[1,128], index: 6, kind: input, shape index: {}]   ;;  %s5603_s7 = inlined_call_operand.hbm [shape: f32[1,4,8], index: 7, kind: output, shape index: {0}]   ;;  %s5604_s8 = inlined_call_operand.hbm [shape: f32[1,4,4], index: 8, kind: output, shape index: {1}]  }
   0x1   :  { %15 = vsyncpa [#allocation6], 0 }
   0x2   :  { %16 = vsyncpa [#allocation4], 0 }
   0x3   :  { %17 = vsyncpa [#allocation10], 0  ;;  %s4651_s27 = smov [#allocation5]   ;;  %s4652_s29 = smov [#allocation2]  }
   0x4   :  { %s39_s28 = sshll.u32 %s4651_s27, 4  ;;  %s25_s30 = sshll.u32 %s4652_s29, 4  ;;  %s40_s28 = int_to_ptr.vmem [resolvable:$true] %s39_s28  ;;  %s4706_s30 = int_to_ptr.vmem [resolvable:$true] %s25_s30 }
   0x5   :  { %s4533_s11 = scalar_lea.hbm %s5599_s3, 2048 }
   0x6   :  { %p4534_p0 = scmp.ne.s32.totalorder %s5599_s3, %s4533_s11  ;;  %p4537_p1 = scmp.lt.u32.totalorder %s4533_s11, %s5599_s3 }
   0x8   :  { %p4539_p2 = pnand %p4537_p1, %p4534_p0 }
   0xa   :  { %4542 = shalt.err (!%p4539_p2)
}
   0xb   :  { %s4543_s16 = scalar_lea.vmem %s40_s28, 2048  ;;  %p4548_p4 = scmp.lt.s32.totalorder %s40_s28, %s40_s28 }
   0xc   :  { %p4544_p3 = scmp.ne.s32.totalorder %s40_s28, %s4543_s16  ;;  %p4549_p5 = scmp.lt.s32.totalorder %s4543_s16, %s4543_s16 }
   0xe   :  { %p4550_p6 = por %p4549_p5, %p4548_p4 }
  0x10   :  { %p4551_p7 = pnand %p4550_p6, %p4544_p3 }
  0x12   :  { %4554 = shalt.err (!%p4551_p7)
}
  0x13   :  { %s4653_s17 = smov 128   ;;  %s4654_s18 = smov 8  }
  0x14   :  { %45 = dma.hbm_to_vmem [thread:$0]  %s5599_s3, 2048, %s40_s28, [#allocation6], %s4653_s17, %s4653_s17, %s4654_s18  }
  0x15   :  { %s4555_s23 = scalar_lea.hbm %s5597_s1, 2048 }
  0x16   :  { %p4556_p8 = scmp.ne.s32.totalorder %s5597_s1, %s4555_s23  ;;  %p4559_p9 = scmp.lt.u32.totalorder %s4555_s23, %s5597_s1 }
  0x18   :  { %p4561_p10 = pnand %p4559_p9, %p4556_p8 }
  0x1a   :  { %4564 = shalt.err (!%p4561_p10)
}
  0x1b   :  { %s4565_s29 = scalar_lea.vmem %s4706_s30, 2048  ;;  %p4570_p12 = scmp.lt.s32.totalorder %s4706_s30, %s4706_s30 }
  0x1c   :  { %p4566_p11 = scmp.ne.s32.totalorder %s4706_s30, %s4565_s29  ;;  %p4571_p13 = scmp.lt.s32.totalorder %s4565_s29, %s4565_s29 }
  0x1e   :  { %p4572_p0 = por %p4571_p13, %p4570_p12 }
  0x20   :  { %p4573_p1 = pnand %p4572_p0, %p4566_p11 }
  0x22   :  { %4576 = shalt.err (!%p4573_p1)
}
  0x23   :  { %31 = dma.hbm_to_vmem [thread:$0]  %s5597_s1, 2048, %s4706_s30, [#allocation3], %s4653_s17, %s4653_s17, %s4654_s18  }
  0x24   :  { %s4655_s9 = smov [#allocation7]   ;;  %s4577_s13 = scalar_lea.hbm %s5601_s5, 2048 }
  0x25   :  { %s53_s10 = sshll.u32 %s4655_s9, 4  ;;  %p4578_p2 = scmp.ne.s32.totalorder %s5601_s5, %s4577_s13  ;;  %s54_s10 = int_to_ptr.vmem [resolvable:$true] %s53_s10 }
  0x26   :  { %p4581_p3 = scmp.lt.u32.totalorder %s4577_s13, %s5601_s5 }
  0x28   :  { %p4583_p4 = pnand %p4581_p3, %p4578_p2 }
  0x2a   :  { %4586 = shalt.err (!%p4583_p4)
}
  0x2b   :  { %s4587_s20 = scalar_lea.vmem %s54_s10, 2048  ;;  %p4592_p6 = scmp.lt.s32.totalorder %s54_s10, %s54_s10 }
  0x2c   :  { %p4588_p5 = scmp.ne.s32.totalorder %s54_s10, %s4587_s20  ;;  %p4593_p7 = scmp.lt.s32.totalorder %s4587_s20, %s4587_s20 }
  0x2e   :  { %p4594_p8 = por %p4593_p7, %p4592_p6 }
  0x30   :  { %p4595_p9 = pnand %p4594_p8, %p4588_p5 }
  0x32   :  { %4598 = shalt.err (!%p4595_p9)
}
  0x33   :  { %59 = dma.hbm_to_vmem [thread:$0]  %s5601_s5, 2048, %s54_s10, [#allocation6], %s4653_s17, %s4653_s17, %s4654_s18  }
  0x34   :  { %4643 = dma.done.wait [#allocation3], 2048  }
  0x35   :  { %4644 = vsyncadd [#allocation3], 4294965248 }
  0x36   :  { %4645 = dma.done.wait [#allocation6], 4096  }
  0x37   :  { %4646 = vsyncadd [#allocation6], 4294963200  ;;  %v4656_v0 = vmov 0.0|0.0   ;;  %vm4657_vm0 = vmmov 0   ;;  %v5610_v1 = vmov 0.0   ;;  %v72_v2 = vld [vmem:[#allocation2] sm:$0xff] }
  0x38   :  { %4035 = vmatprep.subr.bf16.mxu1 %v4656_v0  ;;  %4083 = vmatprep.subr.bf16.mxu0 %v4656_v0  ;;  %v73_v3 = vld [vmem:[#allocation2 + $0x8] sm:$0xff]  ;;  %v74_v4 = vld [vmem:[#allocation2 + $0x10] sm:$0xff]  ;;  %v96_v5 = vand.u32 4294901760, %v72_v2  ;;  %v75_v7 = vld [vmem:[#allocation2 + $0x18] sm:$0xff]  ;;  %vm2517_vm2 = vcmask 64512   ;;  %vm2980_vm3 = vcmask 27648  }
  0x39   :  { %3377 = vmatprep.mubr.msk.f32.mxu1 %vm4657_vm0, %v5610_v1  ;;  %3447 = vmatprep.mubr.msk.f32.mxu0 %vm4657_vm0, %v5610_v1  ;;  %v99_v6 = vand.u32 4294901760, %v73_v3  ;;  %v102_v8 = vand.u32 4294901760, %v74_v4  ;;  %v76_v9 = vld [vmem:[#allocation2 + $0x20] sm:$0xff]  ;;  %v77_v10 = vld [vmem:[#allocation2 + $0x28] sm:$0xff]  ;;  %v105_v11 = vand.u32 4294901760, %v75_v7  ;;  %v78_v19 = vld [vmem:[#allocation2 + $0x30] sm:$0xff] }
  0x3a   :  { %v108_v12 = vand.u32 4294901760, %v76_v9  ;;  %v111_v13 = vand.u32 4294901760, %v77_v10  ;;  %v4766_v15 = vsub.f32 %v72_v2, %v96_v5  ;;  %v79_v20 = vld [vmem:[#allocation2 + $0x38] sm:$0xff]  ;;  %v114_v26 = vand.u32 4294901760, %v78_v19  ;;  %v80_v28 = vld [vmem:[#allocation2 + $0x40] sm:$0xff]  ;;  %v81_v29 = vld [vmem:[#allocation2 + $0x48] sm:$0xff] }
  0x3b   :  { %v4764_v14 = vpack.c.bf16 %v99_v6, %v96_v5  ;;  %v4768_v16 = vsub.f32 %v73_v3, %v99_v6  ;;  %v4770_v17 = vsub.f32 %v74_v4, %v102_v8  ;;  %v4772_v18 = vsub.f32 %v75_v7, %v105_v11  ;;  %v82_v36 = vld [vmem:[#allocation2 + $0x50] sm:$0xff]  ;;  %v83_v37 = vld [vmem:[#allocation2 + $0x58] sm:$0xff]  ;;  %v71_v39 = vld [vmem:[%s5596_s0] sm:$0xff] }
  0x3c   :  { %v4777_v22 = vpack.c.bf16 %v105_v11, %v102_v8  ;;  %v4780_v23 = vsub.f32 %v76_v9, %v108_v12  ;;  %v4784_v25 = vsub.f32 %v77_v10, %v111_v13  ;;  %v117_v27 = vand.u32 4294901760, %v79_v20  ;;  %v84_v45 = vld [vmem:[#allocation2 + $0x60] sm:$0xff]  ;;  %v85_v46 = vld [vmem:[#allocation2 + $0x68] sm:$0xff]  ;;  %v86_v54 = vld [vmem:[#allocation2 + $0x70] sm:$0xff] }
  0x3d   :  { %4037 = vmatpush3.bf16.msra.mxu1 %v4764_v14  ;;  %v4084_v21 = vpack.c.bf16 %v4768_v16, %v4766_v15  ;;  %v4087_v24 = vpack.c.bf16 %v4772_v18, %v4770_v17  ;;  %v4788_v30 = vpack.c.bf16 %v111_v13, %v108_v12  ;;  %v120_v31 = vand.u32 4294901760, %v80_v28  ;;  %v87_v55 = vld [vmem:[#allocation2 + $0x78] sm:$0xff] }
  0x3e   :  { %4038 = vmatprep.subr.bf16.mxu1 %v4656_v0  ;;  %v4090_v32 = vpack.c.bf16 %v4784_v25, %v4780_v23  ;;  %v4793_v33 = vsub.f32 %v78_v19, %v114_v26  ;;  %v4795_v34 = vsub.f32 %v79_v20, %v117_v27  ;;  %v123_v35 = vand.u32 4294901760, %v81_v29 }
  0x3f   :  { %4085 = vmatpush3.bf16.msra.mxu0 %v4084_v21  ;;  %v4799_v38 = vpack.c.bf16 %v117_v27, %v114_v26  ;;  %v126_v40 = vand.u32 4294901760, %v82_v36  ;;  %v4807_v42 = vsub.f32 %v80_v28, %v120_v31  ;;  %v129_v44 = vand.u32 4294901760, %v83_v37 }
  0x40   :  { %4086 = vmatprep.subr.bf16.mxu0 %v4656_v0  ;;  %v4093_v41 = vpack.c.bf16 %v4795_v34, %v4793_v33  ;;  %v4809_v43 = vsub.f32 %v81_v29, %v123_v35  ;;  %v4812_v47 = vand.u32 4294901760, %v71_v39  ;;  %v4815_v48 = vpack.c.bf16 %v123_v35, %v120_v31 }
  0x41   :  { %4040 = vmatpush3.bf16.msra.mxu1 %v4777_v22  ;;  %v4818_v49 = vsub.f32 %v82_v36, %v126_v40  ;;  %v4822_v51 = vsub.f32 %v83_v37, %v129_v44  ;;  %v132_v52 = vand.u32 4294901760, %v84_v45  ;;  %v135_v53 = vand.u32 4294901760, %v85_v46 }
  0x42   :  { %4041 = vmatprep.subr.bf16.mxu1 %v4656_v0  ;;  %v4096_v50 = vpack.c.bf16 %v4809_v43, %v4807_v42  ;;  %v4826_v56 = vsub.f32 %v71_v39, %v4812_v47  ;;  %v189_v57 = vand.u32 4294901760, %v4766_v15  ;;  %v196_v58 = vand.u32 4294901760, %v4768_v16 }
  0x43   :  { %4088 = vmatpush3.bf16.msra.mxu0 %v4087_v24  ;;  %v4831_v59 = vpack.c.bf16 %v129_v44, %v126_v40  ;;  %v138_v60 = vand.u32 4294901760, %v86_v54  ;;  %v4099_v61 = vpack.c.bf16 %v4822_v51, %v4818_v49  ;;  %v4836_v62 = vsub.f32 %v84_v45, %v132_v52 }
  0x44   :  { %4089 = vmatprep.subr.bf16.mxu0 %v4656_v0  ;;  %v4838_v63 = vsub.f32 %v85_v46, %v135_v53  ;;  %v141_v2 = vand.u32 4294901760, %v87_v55  ;;  %v4841_v3 = vpack.c.bf16 %v135_v53, %v132_v52  ;;  %v4844_v4 = vand.u32 4294901760, %v4826_v56 }
  0x45   :  { %4043 = vmatpush3.bf16.msra.mxu1 %v4788_v30  ;;  %v190_v5 = vsub.f32 %v4766_v15, %v189_v57  ;;  %v197_v6 = vsub.f32 %v4768_v16, %v196_v58  ;;  %v203_v7 = vand.u32 4294901760, %v4770_v17  ;;  %v210_v8 = vand.u32 4294901760, %v4772_v18 }
  0x46   :  { %4044 = vmatprep.subr.bf16.mxu1 %v4656_v0  ;;  %v4102_v9 = vpack.c.bf16 %v4838_v63, %v4836_v62  ;;  %v4858_v10 = vsub.f32 %v86_v54, %v138_v60  ;;  %v4860_v11 = vsub.f32 %v87_v55, %v141_v2  ;;  %v4863_v12 = vpack.c.bf16 %v141_v2, %v138_v60 }
  0x47   :  { %4091 = vmatpush3.bf16.msra.mxu0 %v4090_v32  ;;  %v179_v13 = vsub.f32 %v4826_v56, %v4844_v4  ;;  %v217_v19 = vand.u32 4294901760, %v4780_v23  ;;  %v224_v20 = vand.u32 4294901760, %v4784_v25  ;;  %v191_v21 = vand.u32 4294901760, %v190_v5 }
  0x48   :  { %4092 = vmatprep.subr.bf16.mxu0 %v4656_v0  ;;  %v198_v24 = vand.u32 4294901760, %v197_v6  ;;  %v204_v26 = vsub.f32 %v4770_v17, %v203_v7  ;;  %v211_v27 = vsub.f32 %v4772_v18, %v210_v8  ;;  %v4105_v28 = vpack.c.bf16 %v4860_v11, %v4858_v10 }
  0x49   :  { %4046 = vmatpush3.bf16.msra.mxu1 %v4799_v38  ;;  %v4880_v29 = vand.u32 4294901760, %v179_v13  ;;  %v218_v31 = vsub.f32 %v4780_v23, %v217_v19  ;;  %v225_v32 = vsub.f32 %v4784_v25, %v224_v20  ;;  %v231_v35 = vand.u32 4294901760, %v4793_v33 }
  0x4a   :  { %4047 = vmatprep.subr.bf16.mxu1 %v4656_v0  ;;  %v4060_v36 = vpack.c.bf16 %v198_v24, %v191_v21  ;;  %v205_v37 = vand.u32 4294901760, %v204_v26  ;;  %v212_v39 = vand.u32 4294901760, %v211_v27  ;;  %v238_v40 = vand.u32 4294901760, %v4795_v34 }
  0x4b   :  { %4094 = vmatpush3.bf16.msra.mxu0 %v4093_v41  ;;  %v219_v41 = vand.u32 4294901760, %v218_v31  ;;  %v226_v44 = vand.u32 4294901760, %v225_v32  ;;  %v232_v45 = vsub.f32 %v4793_v33, %v231_v35  ;;  %v245_v52 = vand.u32 4294901760, %v4807_v42 }
  0x4c   :  { %4095 = vmatprep.subr.bf16.mxu0 %v4656_v0  ;;  %v4063_v46 = vpack.c.bf16 %v212_v39, %v205_v37  ;;  %v252_v53 = vand.u32 4294901760, %v4809_v43  ;;  %v259_v55 = vand.u32 4294901760, %v4818_v49  ;;  %v266_v60 = vand.u32 4294901760, %v4822_v51 }
  0x4d   :  { %4049 = vmatpush3.bf16.msra.mxu1 %v4815_v48  ;;  %v233_v54 = vand.u32 4294901760, %v232_v45  ;;  %v246_v5 = vsub.f32 %v4807_v42, %v245_v52  ;;  %v5608_v21 = vand.u32 4294901760, %v4836_v62 }
  0x4e   :  { %4050 = vmatprep.subr.bf16.mxu1 %v4656_v0  ;;  %v253_v6 = vsub.f32 %v4809_v43, %v252_v53  ;;  %v267_v13 = vsub.f32 %v4822_v51, %v266_v60 }
  0x4f   :  { %4097 = vmatpush3.bf16.msra.mxu0 %v4096_v50  ;;  %v239_v50 = vsub.f32 %v4795_v34, %v238_v40  ;;  %v247_v26 = vand.u32 4294901760, %v246_v5  ;;  %v274_v39 = vsub.f32 %v4836_v62, %v5608_v21  ;;  %v738_v5 = vld [vmem:[#allocation5 + $0x8] sm:$0xff] }
  0x50   :  { %4098 = vmatprep.subr.bf16.mxu0 %v4656_v0  ;;  %v254_v27 = vand.u32 4294901760, %v253_v6  ;;  %v268_v32 = vand.u32 4294901760, %v267_v13 }
  0x51   :  { %4052 = vmatpush3.bf16.msra.mxu1 %v4831_v59  ;;  %v240_v2 = vand.u32 4294901760, %v239_v50  ;;  %v275_v50 = vand.u32 4294901760, %v274_v39 }
  0x52   :  { %4053 = vmatprep.subr.bf16.mxu1 %v4656_v0  ;;  %v4072_v37 = vpack.c.bf16 %v254_v27, %v247_v26  ;;  %v764_v26 = vand.u32 4294901760, %v738_v5  ;;  %v739_v27 = vld [vmem:[#allocation5 + $0x10] sm:$0xff] }
  0x53   :  { %4100 = vmatpush3.bf16.msra.mxu0 %v4099_v61  ;;  %v4066_v61 = vpack.c.bf16 %v226_v44, %v219_v41  ;;  %v4069_v24 = vpack.c.bf16 %v240_v2, %v233_v54  ;;  %v5605_v44 = vand.u32 4294901760, %v4860_v11  ;;  %v737_v2 = vld [vmem:[#allocation5] sm:$0xff] }
  0x54   :  { %4101 = vmatprep.subr.bf16.mxu0 %v4656_v0  ;;  %v4957_v39 = vsub.f32 %v738_v5, %v764_v26 }
  0x55   :  { %4055 = vmatpush3.bf16.msra.mxu1 %v4841_v3 }
  0x56   :  { %4056 = vmatprep.subr.bf16.mxu1 %v4656_v0  ;;  %v5613_v5 = vand.u32 4294901760, %v4957_v39  ;;  %v5623_v51 = vand.u32 4294901760, %v4957_v39 }
  0x57   :  { %4103 = vmatpush3.bf16.msra.mxu0 %v4102_v9  ;;  %v260_v9 = vsub.f32 %v4818_v49, %v259_v55 }
  0x58   :  { %4104 = vmatprep.subr.bf16.mxu0 %v4656_v0 }
  0x59   :  { %4058 = vmatpush3.bf16.msra.mxu1 %v4863_v12  ;;  %v261_v31 = vand.u32 4294901760, %v260_v9 }
  0x5a   :  { %4059 = vmatprep.subr.bf16.mxu1 %v4656_v0 }
  0x5b   :  { %4106 = vmatpush3.bf16.msra.mxu0 %v4105_v28  ;;  %v5607_v28 = vand.u32 4294901760, %v4838_v63 }
  0x5c   :  { %3378 = vmatmul.mubr.f32.vlgmr.msra.gmra.mrb[0].mxu1 %v4880_v29  ;;  %4107 = vmatprep.subr.bf16.mxu0 %v4656_v0 }
  0x5d   :  { %4061 = vmatpush3.bf16.msra.mxu1 %v4060_v36  ;;  %3412 = vmatprep.mubr.msk.f32.mxu1 %vm4657_vm0, %v5610_v1  ;;  %v5606_v36 = vand.u32 4294901760, %v4858_v10  ;;  %v281_v41 = vsub.f32 %v4838_v63, %v5607_v28 }
  0x5e   :  { %3448 = vmatmul.mubr.f32.vlgmr.msra.gmra.mrb[0].mxu0 %v4826_v56  ;;  %4062 = vmatprep.subr.bf16.mxu1 %v4656_v0 }
  0x5f   :  { %4109 = vmatpush3.bf16.msra.mxu0 %v4764_v14  ;;  %3482 = vmatprep.mubr.msk.f32.mxu0 %vm4657_vm0, %v5610_v1  ;;  %v288_v45 = vsub.f32 %v4858_v10, %v5606_v36  ;;  %v282_v54 = vand.u32 4294901760, %v281_v41  ;;  %v767_v41 = vand.u32 4294901760, %v739_v27  ;;  %v746_v36 = vld [vmem:[#allocation5 + $0x48] sm:$0xff] }
  0x60   :  { %4110 = vmatprep.subr.bf16.mxu0 %v4656_v0 }
  0x61   :  { %4064 = vmatpush3.bf16.msra.mxu1 %v4063_v46  ;;  %v4075_v46 = vpack.c.bf16 %v268_v32, %v261_v31  ;;  %v4078_v6 = vpack.c.bf16 %v282_v54, %v275_v50  ;;  %v289_v9 = vand.u32 4294901760, %v288_v45  ;;  %v740_v31 = vld [vmem:[#allocation5 + $0x18] sm:$0xff]  ;;  %v742_v50 = vld [vmem:[#allocation5 + $0x28] sm:$0xff]  ;;  %v4962_v54 = vsub.f32 %v739_v27, %v767_v41 }
  0x62   :  { %4065 = vmatprep.subr.bf16.mxu1 %v4656_v0  ;;  %v770_v45 = vand.u32 4294901760, %v740_v31  ;;  %v4132_v27 = vpack.c.bf16 %v196_v58, %v189_v57 }
  0x63   :  { %4112 = vmatpush3.bf16.msra.mxu0 %v4777_v22  ;;  %v5612_v15 = vand.u32 4294901760, %v4962_v54 }
  0x64   :  { %4113 = vmatprep.subr.bf16.mxu0 %v4656_v0  ;;  %v4991_v57 = vpack.c.bf16 %v770_v45, %v767_v41  ;;  %v4135_v41 = vpack.c.bf16 %v210_v8, %v203_v7  ;;  %v788_v7 = vand.u32 4294901760, %v746_v36 }
  0x65   :  { %4067 = vmatpush3.bf16.msra.mxu1 %v4066_v61  ;;  %v295_v61 = vsub.f32 %v4860_v11, %v5605_v44  ;;  %v744_v44 = vld [vmem:[#allocation5 + $0x38] sm:$0xff] }
  0x66   :  { %4068 = vmatprep.subr.bf16.mxu1 %v4656_v0 }
  0x67   :  { %4115 = vmatpush3.bf16.msra.mxu0 %v4788_v30  ;;  %v296_v13 = vand.u32 4294901760, %v295_v61  ;;  %v4964_v61 = vsub.f32 %v740_v31, %v770_v45  ;;  %v743_v31 = vld [vmem:[#allocation5 + $0x30] sm:$0xff]  ;;  %v745_v45 = vld [vmem:[#allocation5 + $0x40] sm:$0xff] }
  0x68   :  { %4116 = vmatprep.subr.bf16.mxu0 %v4656_v0  ;;  %v779_v58 = vand.u32 4294901760, %v743_v31  ;;  %v785_v18 = vand.u32 4294901760, %v745_v45 }
  0x69   :  { %4070 = vmatpush3.bf16.msra.mxu1 %v4069_v24  ;;  %v761_v24 = vand.u32 4294901760, %v737_v2  ;;  %v4081_v32 = vpack.c.bf16 %v296_v13, %v289_v9  ;;  %v776_v13 = vand.u32 4294901760, %v742_v50  ;;  %v5609_v16 = vand.u32 4294901760, %v4964_v61 }
  0x6a   :  { %4071 = vmatprep.subr.bf16.mxu1 %v4656_v0  ;;  %v5010_v28 = vsub.f32 %v743_v31, %v779_v58  ;;  %v747_v31 = vld [vmem:[#allocation5 + $0x50] sm:$0xff] }
  0x6b   :  { %4118 = vmatpush3.bf16.msra.mxu0 %v4799_v38  ;;  %v791_v23 = vand.u32 4294901760, %v747_v31 }
  0x6c   :  { %4119 = vmatprep.subr.bf16.mxu0 %v4656_v0 }
  0x6d   :  { %4073 = vmatpush3.bf16.msra.mxu1 %v4072_v37  ;;  %v4955_v37 = vsub.f32 %v737_v2, %v761_v24 }
  0x6e   :  { %4074 = vmatprep.subr.bf16.mxu1 %v4656_v0 }
  0x6f   :  { %4121 = vmatpush3.bf16.msra.mxu0 %v4815_v48  ;;  %v854_v2 = vand.u32 4294901760, %v4955_v37 }
  0x70   :  { %4122 = vmatprep.subr.bf16.mxu0 %v4656_v0 }
  0x71   :  { %4076 = vmatpush3.bf16.msra.mxu1 %v4075_v46  ;;  %v741_v46 = vld [vmem:[#allocation5 + $0x20] sm:$0xff]  ;;  %v855_v49 = vsub.f32 %v4955_v37, %v854_v2 }
  0x72   :  { %4077 = vmatprep.subr.bf16.mxu1 %v4656_v0  ;;  %v773_v9 = vand.u32 4294901760, %v741_v46 }
  0x73   :  { %4124 = vmatpush3.bf16.msra.mxu0 %v4831_v59 }
  0x74   :  { %4125 = vmatprep.subr.bf16.mxu0 %v4656_v0  ;;  %v5017_v17 = vpack.c.bf16 %v776_v13, %v773_v9 }
  0x75   :  { %4079 = vmatpush3.bf16.msra.mxu1 %v4078_v6  ;;  %v4966_v6 = vpack.c.bf16 %v764_v26, %v761_v24  ;;  %v4980_v24 = vpack.c.bf16 %v5613_v5, %v854_v2  ;;  %v4984_v26 = vsub.f32 %v741_v46, %v773_v9  ;;  %v782_v46 = vand.u32 4294901760, %v744_v44 }
  0x76   :  { %4080 = vmatprep.subr.bf16.mxu1 %v4656_v0  ;;  %v5031_v9 = vsub.f32 %v745_v45, %v785_v18  ;;  %v750_v45 = vld [vmem:[#allocation5 + $0x68] sm:$0xff] }
  0x77   :  { %4127 = vmatpush3.bf16.msra.mxu0 %v4841_v3  ;;  %v5012_v21 = vsub.f32 %v744_v44, %v782_v46  ;;  %v4138_v44 = vpack.c.bf16 %v224_v20, %v217_v19  ;;  %v4141_v20 = vpack.c.bf16 %v238_v40, %v231_v35  ;;  %v800_v34 = vand.u32 4294901760, %v750_v45  ;;  %v751_v40 = vld [vmem:[#allocation5 + $0x70] sm:$0xff] }
  0x78   :  { %4128 = vmatprep.subr.bf16.mxu0 %v4656_v0  ;;  %v803_v42 = vand.u32 4294901760, %v751_v40 }
  0x79   :  { %4082 = vmatpush3.bf16.msra.mxu1 %v4081_v32  ;;  %v4986_v32 = vsub.f32 %v742_v50, %v776_v13  ;;  %v5001_v50 = vpack.c.bf16 %v5609_v16, %v5612_v15  ;;  %v5615_v16 = vand.u32 4294901760, %v4984_v26  ;;  %v5033_v13 = vsub.f32 %v746_v36, %v788_v7  ;;  %v749_v36 = vld [vmem:[#allocation5 + $0x60] sm:$0xff] }
  0x7a   :  { %4179 = vmatprep.subr.bf16.mxu1 %v4656_v0  ;;  %v5617_v15 = vand.u32 4294901760, %v5010_v28  ;;  %v5616_v5 = vand.u32 4294901760, %v5012_v21  ;;  %v797_v33 = vand.u32 4294901760, %v749_v36 }
  0x7b   :  { %4130 = vmatpush3.bf16.msra.mxu0 %v4863_v12 }
  0x7c   :  { %3413 = vmatmul.mubr.f32.vlgmr.msra.gmra.mrb[0].mxu1 %v4812_v47  ;;  %4131 = vmatprep.subr.bf16.mxu0 %v4656_v0  ;;  %v5045_v19 = vpack.c.bf16 %v5616_v5, %v5617_v15 }
  0x7d   :  { %4181 = vmatpush3.bf16.msra.mxu1 %v4966_v6  ;;  %3587 = vmatprep.mubr.msk.f32.mxu1 %vm4657_vm0, %v5610_v1 }
  0x7e   :  { %3483 = vmatmul.mubr.f32.vlgmr.msra.gmra.mrb[0].mxu0 %v4844_v4  ;;  %4182 = vmatprep.subr.bf16.mxu1 %v4656_v0 }
  0x7f   :  { %4133 = vmatpush3.bf16.msra.mxu0 %v4132_v27  ;;  %3517 = vmatprep.mubr.msk.f32.mxu0 %vm4657_vm0, %v5610_v1  ;;  %v5614_v27 = vand.u32 4294901760, %v4986_v32  ;;  %v748_v1 = vld [vmem:[#allocation5 + $0x58] sm:$0xff] }
  0x80   :  { %4134 = vmatprep.subr.bf16.mxu0 %v4656_v0  ;;  %v794_v25 = vand.u32 4294901760, %v748_v1 }
  0x81   :  { %4184 = vmatpush3.bf16.msra.mxu1 %v4991_v57  ;;  %v5024_v8 = vpack.c.bf16 %v5614_v27, %v5615_v16  ;;  %v910_v27 = vand.u32 4294901760, %v5031_v9  ;;  %v917_v16 = vand.u32 4294901760, %v5033_v13 }
  0x82   :  { %4185 = vmatprep.subr.bf16.mxu1 %v4656_v0 }
  0x83   :  { %4136 = vmatpush3.bf16.msra.mxu0 %v4135_v41  ;;  %v5038_v41 = vpack.c.bf16 %v782_v46, %v779_v58  ;;  %v5052_v58 = vsub.f32 %v747_v31, %v791_v23  ;;  %v5054_v46 = vsub.f32 %v748_v1, %v794_v25  ;;  %v5066_v35 = vpack.c.bf16 %v917_v16, %v910_v27  ;;  %v752_v31 = vld [vmem:[#allocation5 + $0x78] sm:$0xff] }
  0x84   :  { %4137 = vmatprep.subr.bf16.mxu0 %v4656_v0  ;;  %v4144_v1 = vpack.c.bf16 %v252_v53, %v245_v52  ;;  %v806_v43 = vand.u32 4294901760, %v752_v31  ;;  %v4147_v53 = vpack.c.bf16 %v266_v60, %v259_v55  ;;  %v862_v55 = vsub.f32 %v4957_v39, %v5623_v51 }
  0x85   :  { %4187 = vmatpush3.bf16.msra.mxu1 %v5017_v17  ;;  %v5619_v5 = vand.u32 4294901760, %v5052_v58  ;;  %v5618_v15 = vand.u32 4294901760, %v5054_v46  ;;  %v856_v51 = vand.u32 4294901760, %v855_v49  ;;  %v5629_v49 = vand.u32 4294901760, %v4860_v11 }
  0x86   :  { %4188 = vmatprep.subr.bf16.mxu1 %v4656_v0  ;;  %v5121_v2 = vpack.c.bf16 %v806_v43, %v803_v42 }
  0x87   :  { %4139 = vmatpush3.bf16.msra.mxu0 %v4138_v44  ;;  %v5059_v44 = vpack.c.bf16 %v788_v7, %v785_v18  ;;  %v5073_v18 = vsub.f32 %v749_v36, %v797_v33  ;;  %v5075_v7 = vsub.f32 %v750_v45, %v800_v34  ;;  %v5087_v52 = vpack.c.bf16 %v5618_v15, %v5619_v5 }
  0x88   :  { %4140 = vmatprep.subr.bf16.mxu0 %v4656_v0  ;;  %v5101_v15 = vpack.c.bf16 %v800_v34, %v797_v33  ;;  %v5624_v33 = vand.u32 4294901760, %v4836_v62  ;;  %v5625_v34 = vand.u32 4294901760, %v4838_v63  ;;  %v863_v5 = vand.u32 4294901760, %v862_v55 }
  0x89   :  { %4190 = vmatpush3.bf16.msra.mxu1 %v5038_v41  ;;  %v5621_v36 = vand.u32 4294901760, %v5073_v18  ;;  %v5620_v45 = vand.u32 4294901760, %v5075_v7  ;;  %v5627_v62 = vand.u32 4294901760, %v4964_v61 }
  0x8a   :  { %4191 = vmatprep.subr.bf16.mxu1 %v4656_v0 }
  0x8b   :  { %4142 = vmatpush3.bf16.msra.mxu0 %v4141_v20  ;;  %v5080_v20 = vpack.c.bf16 %v794_v25, %v791_v23  ;;  %v5094_v23 = vsub.f32 %v751_v40, %v803_v42  ;;  %v5096_v25 = vsub.f32 %v752_v31, %v806_v43  ;;  %v5114_v60 = vpack.c.bf16 %v5620_v45, %v5621_v36 }
  0x8c   :  { %4143 = vmatprep.subr.bf16.mxu0 %v4656_v0  ;;  %v5626_v45 = vand.u32 4294901760, %v4962_v54  ;;  %v876_v63 = vsub.f32 %v4964_v61, %v5627_v62  ;;  %v5628_v43 = vand.u32 4294901760, %v4858_v10  ;;  %v5632_v10 = vand.u32 4294901760, %v5010_v28 }
  0x8d   :  { %4193 = vmatpush3.bf16.msra.mxu1 %v5059_v44  ;;  %v952_v40 = vand.u32 4294901760, %v5094_v23  ;;  %v5622_v31 = vand.u32 4294901760, %v5096_v25 }
  0x8e   :  { %4194 = vmatprep.subr.bf16.mxu1 %v4656_v0  ;;  %v4153_v55 = vpack.c.bf16 %v5629_v49, %v5628_v43  ;;  %v877_v36 = vand.u32 4294901760, %v876_v63  ;;  %v897_v11 = vsub.f32 %v5010_v28, %v5632_v10 }
  0x8f   :  { %4145 = vmatpush3.bf16.msra.mxu0 %v4144_v1  ;;  %v4150_v1 = vpack.c.bf16 %v5625_v34, %v5624_v33  ;;  %v5135_v42 = vpack.c.bf16 %v5622_v31, %v952_v40  ;;  %v4204_v34 = vpack.c.bf16 %v863_v5, %v856_v51  ;;  %v5631_v31 = vand.u32 4294901760, %v4986_v32 }
  0x90   :  { %4146 = vmatprep.subr.bf16.mxu0 %v4656_v0 }
  0x91   :  { %4196 = vmatpush3.bf16.msra.mxu1 %v5080_v20 }
  0x92   :  { %4197 = vmatprep.subr.bf16.mxu1 %v4656_v0 }
  0x93   :  { %4148 = vmatpush3.bf16.msra.mxu0 %v4147_v53  ;;  %v869_v53 = vsub.f32 %v4962_v54, %v5626_v45  ;;  %v5630_v45 = vand.u32 4294901760, %v4984_v26 }
  0x94   :  { %4149 = vmatprep.subr.bf16.mxu0 %v4656_v0 }
  0x95   :  { %4199 = vmatpush3.bf16.msra.mxu1 %v5101_v15  ;;  %v883_v33 = vsub.f32 %v4984_v26, %v5630_v45  ;;  %v870_v62 = vand.u32 4294901760, %v869_v53  ;;  %v5633_v53 = vand.u32 4294901760, %v5012_v21  ;;  %v911_v45 = vsub.f32 %v5031_v9, %v910_v27 }
  0x96   :  { %4200 = vmatprep.subr.bf16.mxu1 %v4656_v0  ;;  %v5636_v27 = vand.u32 4294901760, %v5054_v46 }
  0x97   :  { %4151 = vmatpush3.bf16.msra.mxu0 %v4150_v1  ;;  %v890_v1 = vsub.f32 %v4986_v32, %v5631_v31  ;;  %v4207_v43 = vpack.c.bf16 %v877_v36, %v870_v62  ;;  %v884_v5 = vand.u32 4294901760, %v883_v33  ;;  %v904_v63 = vsub.f32 %v5012_v21, %v5633_v53 }
  0x98   :  { %4152 = vmatprep.subr.bf16.mxu0 %v4656_v0  ;;  %v5634_v31 = vmov 0.0   ;;  %v898_v36 = vand.u32 4294901760, %v897_v11  ;;  %v918_v33 = vsub.f32 %v5033_v13, %v917_v16  ;;  %v932_v11 = vsub.f32 %v5054_v46, %v5636_v27 }
  0x99   :  { %4202 = vmatpush3.bf16.msra.mxu1 %v5121_v2  ;;  %v891_v51 = vand.u32 4294901760, %v890_v1  ;;  %v912_v1 = vand.u32 4294901760, %v911_v45  ;;  %v5638_v53 = vand.u32 4294901760, %v5075_v7  ;;  %v5639_v45 = vand.u32 4294901760, %v5096_v25 }
  0x9a   :  { %4203 = vmatprep.subr.bf16.mxu1 %v4656_v0  ;;  %v919_v10 = vand.u32 4294901760, %v918_v33 }
  0x9b   :  { %4154 = vmatpush3.bf16.msra.mxu0 %v4153_v55  ;;  %v4210_v49 = vpack.c.bf16 %v891_v51, %v884_v5  ;;  %v905_v55 = vand.u32 4294901760, %v904_v63  ;;  %v5637_v5 = vand.u32 4294901760, %v5073_v18  ;;  %v946_v63 = vsub.f32 %v5075_v7, %v5638_v53 }
  0x9c   :  { %3588 = vmatmul.mubr.f32.vlgmr.msra.gmra.mrb[2].mxu1 %v4880_v29  ;;  %4155 = vmatprep.subr.bf16.mxu0 %v4656_v0  ;;  %v4216_v16 = vpack.c.bf16 %v919_v10, %v912_v1  ;;  %v960_v33 = vsub.f32 %v5096_v25, %v5639_v45 }
  0x9d   :  { %4205 = vmatpush3.bf16.msra.mxu1 %v4204_v34  ;;  %3622 = vmatprep.mubr.msk.f32.mxu1 %vm4657_vm0, %v5634_v31  ;;  %v4213_v62 = vpack.c.bf16 %v905_v55, %v898_v36  ;;  %v939_v51 = vsub.f32 %v5073_v18, %v5637_v5  ;;  %v947_v55 = vand.u32 4294901760, %v946_v63  ;;  %v1413_v5 = vld [vmem:[#allocation7 + $0x60] sm:$0xff] }
  0x9e   :  { %3518 = vmatmul.mubr.f32.vlgmr.msra.gmra.mrb[0].mxu0 %v4812_v47  ;;  %4206 = vmatprep.subr.bf16.mxu1 %v4656_v0  ;;  %v1461_v63 = vand.u32 4294901760, %v1413_v5 }
  0x9f   :  { %4157 = vmatpush3.bf16.msra.mxu0 %v4764_v14  ;;  %3552 = vmatprep.mubr.msk.f32.mxu0 %vm4657_vm0, %v5634_v31  ;;  %v5635_v14 = vand.u32 4294901760, %v5052_v58 }
  0xa0   :  { %4158 = vmatprep.subr.bf16.mxu0 %v4656_v0 }
  0xa1   :  { %4208 = vmatpush3.bf16.msra.mxu1 %v4207_v43  ;;  %v925_v34 = vsub.f32 %v5052_v58, %v5635_v14  ;;  %v933_v43 = vand.u32 4294901760, %v932_v11  ;;  %v1411_v11 = vld [vmem:[#allocation7 + $0x50] sm:$0xff] }
  0xa2   :  { %4209 = vmatprep.subr.bf16.mxu1 %v4656_v0 }
  0xa3   :  { %4160 = vmatpush3.bf16.msra.mxu0 %v4777_v22  ;;  %v926_v22 = vand.u32 4294901760, %v925_v34  ;;  %v961_v34 = vand.u32 4294901760, %v960_v33 }
  0xa4   :  { %4161 = vmatprep.subr.bf16.mxu0 %v4656_v0 }
  0xa5   :  { %4211 = vmatpush3.bf16.msra.mxu1 %v4210_v49  ;;  %v4219_v36 = vpack.c.bf16 %v933_v43, %v926_v22  ;;  %v940_v49 = vand.u32 4294901760, %v939_v51  ;;  %v1412_v22 = vld [vmem:[#allocation7 + $0x58] sm:$0xff]  ;;  %v5324_v51 = vld [vmem:[#allocation7 + $0x68] sm:$0xff] }
  0xa6   :  { %4212 = vmatprep.subr.bf16.mxu1 %v4656_v0  ;;  %v1458_v43 = vand.u32 4294901760, %v1412_v22 }
  0xa7   :  { %4163 = vmatpush3.bf16.msra.mxu0 %v4788_v30  ;;  %v953_v30 = vsub.f32 %v5094_v23, %v952_v40 }
  0xa8   :  { %4164 = vmatprep.subr.bf16.mxu0 %v4656_v0 }
  0xa9   :  { %4214 = vmatpush3.bf16.msra.mxu1 %v4213_v62  ;;  %v954_v14 = vand.u32 4294901760, %v953_v30  ;;  %v1464_v30 = vand.u32 4294901760, %v5324_v51 }
  0xaa   :  { %4215 = vmatprep.subr.bf16.mxu1 %v4656_v0 }
  0xab   :  { %4166 = vmatpush3.bf16.msra.mxu0 %v4799_v38  ;;  %v4222_v38 = vpack.c.bf16 %v947_v55, %v940_v49  ;;  %v4225_v40 = vpack.c.bf16 %v961_v34, %v954_v14  ;;  %v5335_v55 = vpack.c.bf16 %v1464_v30, %v1461_v63  ;;  %v1416_v14 = vld [vmem:[#allocation7 + $0x78] sm:$0xff] }
  0xac   :  { %4167 = vmatprep.subr.bf16.mxu0 %v4656_v0 }
  0xad   :  { %4217 = vmatpush3.bf16.msra.mxu1 %v4216_v16  ;;  %v1455_v16 = vand.u32 4294901760, %v1411_v11 }
  0xae   :  { %4218 = vmatprep.subr.bf16.mxu1 %v4656_v0 }
  0xaf   :  { %4169 = vmatpush3.bf16.msra.mxu0 %v4815_v48  ;;  %v4228_v48 = vpack.c.bf16 %v4957_v39, %v4955_v37  ;;  %v4240_v37 = vpack.c.bf16 %v5033_v13, %v5031_v9  ;;  %v4243_v39 = vpack.c.bf16 %v5054_v46, %v5052_v58  ;;  %v1403_v13 = vld [vmem:[#allocation7 + $0x10] sm:$0xff]  ;;  %v5326_v53 = vpack.c.bf16 %v1458_v43, %v1455_v16 }
  0xb0   :  { %4170 = vmatprep.subr.bf16.mxu0 %v4656_v0 }
  0xb1   :  { %4220 = vmatpush3.bf16.msra.mxu1 %v4219_v36 }
  0xb2   :  { %4221 = vmatprep.subr.bf16.mxu1 %v4656_v0 }
  0xb3   :  { %4172 = vmatpush3.bf16.msra.mxu0 %v4831_v59  ;;  %v4231_v59 = vpack.c.bf16 %v4964_v61, %v4962_v54  ;;  %v4246_v54 = vpack.c.bf16 %v5075_v7, %v5073_v18 }
  0xb4   :  { %4173 = vmatprep.subr.bf16.mxu0 %v4656_v0 }
  0xb5   :  { %4223 = vmatpush3.bf16.msra.mxu1 %v4222_v38  ;;  %v1415_v38 = vld [vmem:[#allocation7 + $0x70] sm:$0xff] }
  0xb6   :  { %4224 = vmatprep.subr.bf16.mxu1 %v4656_v0  ;;  %v1467_v34 = vand.u32 4294901760, %v1415_v38 }
  0xb7   :  { %4175 = vmatpush3.bf16.msra.mxu0 %v4841_v3  ;;  %v4234_v3 = vpack.c.bf16 %v4986_v32, %v4984_v26 }
  0xb8   :  { %4176 = vmatprep.subr.bf16.mxu0 %v4656_v0 }
  0xb9   :  { %4226 = vmatpush3.bf16.msra.mxu1 %v4225_v40  ;;  %v1470_v40 = vand.u32 4294901760, %v1416_v14 }
  0xba   :  { %4227 = vmatprep.subr.bf16.mxu1 %v4656_v0 }
  0xbb   :  { %4178 = vmatpush3.bf16.msra.mxu0 %v4863_v12  ;;  %v4237_v12 = vpack.c.bf16 %v5012_v21, %v5010_v28  ;;  %v4249_v21 = vpack.c.bf16 %v5096_v25, %v5094_v23  ;;  %v1408_v23 = vld [vmem:[#allocation7 + $0x38] sm:$0xff] }
  0xbc   :  { %3623 = vmatmul.mubr.f32.vlgmr.msra.gmra.mrb[2].mxu1 %v4812_v47  ;;  %4323 = vmatprep.subr.bf16.mxu0 %v4656_v0 }
  0xbd   :  { %4229 = vmatpush3.bf16.msra.mxu1 %v4228_v48  ;;  %3657 = vmatprep.mubr.msk.f32.mxu1 %vm4657_vm0, %v5634_v31 }
  0xbe   :  { %3553 = vmatmul.mubr.f32.vlgmr.msra.gmra.mrb[0].mxu0 %v4812_v47  ;;  %4230 = vmatprep.subr.bf16.mxu1 %v4656_v0 }
  0xbf   :  { %3797 = vmatprep.mubr.msk.f32.mxu0 %vm4657_vm0, %v5634_v31 }
  0xc1   :  { %4232 = vmatpush3.bf16.msra.mxu1 %v4231_v59 }
  0xc2   :  { %4233 = vmatprep.subr.bf16.mxu1 %v4656_v0 }
  0xc5   :  { %4235 = vmatpush3.bf16.msra.mxu1 %v4234_v3  ;;  %v5345_v3 = vpack.c.bf16 %v1470_v40, %v1467_v34 }
  0xc6   :  { %4236 = vmatprep.subr.bf16.mxu1 %v4656_v0 }
  0xc9   :  { %4238 = vmatpush3.bf16.msra.mxu1 %v4237_v12 }
  0xca   :  { %4239 = vmatprep.subr.bf16.mxu1 %v4656_v0 }
  0xcd   :  { %4241 = vmatpush3.bf16.msra.mxu1 %v4240_v37 }
  0xce   :  { %4242 = vmatprep.subr.bf16.mxu1 %v4656_v0 }
  0xd1   :  { %4244 = vmatpush3.bf16.msra.mxu1 %v4243_v39 }
  0xd2   :  { %4245 = vmatprep.subr.bf16.mxu1 %v4656_v0 }
  0xd5   :  { %4247 = vmatpush3.bf16.msra.mxu1 %v4246_v54 }
  0xd6   :  { %4248 = vmatprep.subr.bf16.mxu1 %v4656_v0 }
  0xd9   :  { %4250 = vmatpush3.bf16.msra.mxu1 %v4249_v21 }
  0xda   :  { %4251 = vmatprep.subr.bf16.mxu1 %v4656_v0 }
  0xdc   :  { %3658 = vmatmul.mubr.f32.vlgmr.msra.gmra.mrb[2].mxu1 %v4826_v56 }
  0xdd   :  { %4253 = vmatpush3.bf16.msra.mxu1 %v4966_v6  ;;  %3692 = vmatprep.mubr.msk.f32.mxu1 %vm4657_vm0, %v5634_v31 }
  0xde   :  { %4254 = vmatprep.subr.bf16.mxu1 %v4656_v0 }
  0xe1   :  { %4256 = vmatpush3.bf16.msra.mxu1 %v4991_v57 }
  0xe2   :  { %4257 = vmatprep.subr.bf16.mxu1 %v4656_v0 }
  0xe5   :  { %4259 = vmatpush3.bf16.msra.mxu1 %v5017_v17 }
  0xe6   :  { %4260 = vmatprep.subr.bf16.mxu1 %v4656_v0 }
  0xe9   :  { %4262 = vmatpush3.bf16.msra.mxu1 %v5038_v41 }
  0xea   :  { %4263 = vmatprep.subr.bf16.mxu1 %v4656_v0 }
  0xed   :  { %4265 = vmatpush3.bf16.msra.mxu1 %v5059_v44 }
  0xee   :  { %4266 = vmatprep.subr.bf16.mxu1 %v4656_v0 }
  0xf1   :  { %4268 = vmatpush3.bf16.msra.mxu1 %v5080_v20 }
  0xf2   :  { %4269 = vmatprep.subr.bf16.mxu1 %v4656_v0 }
  0xf5   :  { %4271 = vmatpush3.bf16.msra.mxu1 %v5101_v15 }
  0xf6   :  { %4272 = vmatprep.subr.bf16.mxu1 %v4656_v0 }
  0xf9   :  { %4274 = vmatpush3.bf16.msra.mxu1 %v5121_v2 }
  0xfa   :  { %4275 = vmatprep.subr.bf16.mxu1 %v4656_v0 }
  0xfc   :  { %3693 = vmatmul.mubr.f32.vlgmr.msra.gmra.mrb[2].mxu1 %v4844_v4 }
  0xfd   :  { %4277 = vmatpush3.bf16.msra.mxu1 %v4980_v24  ;;  %3727 = vmatprep.mubr.msk.f32.mxu1 %vm4657_vm0, %v5634_v31 }
  0xfe   :  { %4278 = vmatprep.subr.bf16.mxu1 %v4656_v0 }
 0x101   :  { %4280 = vmatpush3.bf16.msra.mxu1 %v5001_v50  ;;  %v1402_v50 = vld [vmem:[#allocation7 + $0x8] sm:$0xff] }
 0x102   :  { %4281 = vmatprep.subr.bf16.mxu1 %v4656_v0 }
 0x105   :  { %4283 = vmatpush3.bf16.msra.mxu1 %v5024_v8  ;;  %v1428_v8 = vand.u32 4294901760, %v1402_v50 }
 0x106   :  { %4284 = vmatprep.subr.bf16.mxu1 %v4656_v0 }
 0x107   :  { %v5331_v49 = vsub.f32 %v1402_v50, %v1428_v8  ;;  %v5369_v50 = vsub.f32 %v1411_v11, %v1455_v16 }
 0x109   :  { %4286 = vmatpush3.bf16.msra.mxu1 %v5045_v19  ;;  %v1431_v19 = vand.u32 4294901760, %v1403_v13  ;;  %v1525_v59 = vand.u32 4294901760, %v5331_v49 }
 0x10a   :  { %4287 = vmatprep.subr.bf16.mxu1 %v4656_v0 }
 0x10b   :  { %v5337_v45 = vsub.f32 %v1403_v13, %v1431_v19  ;;  %v1526_v54 = vsub.f32 %v5331_v49, %v1525_v59  ;;  %v5373_v13 = vsub.f32 %v1412_v22, %v1458_v43  ;;  %v5392_v22 = vsub.f32 %v1413_v5, %v1461_v63 }
 0x10c   :  { %v5402_v63 = vsub.f32 %v1416_v14, %v1470_v40 }
 0x10d   :  { %4289 = vmatpush3.bf16.msra.mxu1 %v5066_v35  ;;  %v1406_v35 = vld [vmem:[#allocation7 + $0x28] sm:$0xff] }
 0x10e   :  { %4290 = vmatprep.subr.bf16.mxu1 %v4656_v0  ;;  %v1440_v7 = vand.u32 4294901760, %v1406_v35  ;;  %v1623_v14 = vand.u32 4294901760, %v5402_v63 }
 0x110   :  { %v5352_v39 = vsub.f32 %v1406_v35, %v1440_v7 }
 0x111   :  { %4292 = vmatpush3.bf16.msra.mxu1 %v5087_v52  ;;  %v1407_v52 = vld [vmem:[#allocation7 + $0x30] sm:$0xff] }
 0x112   :  { %4293 = vmatprep.subr.bf16.mxu1 %v4656_v0  ;;  %v1443_v25 = vand.u32 4294901760, %v1407_v52  ;;  %v1553_v35 = vand.u32 4294901760, %v5352_v39 }
 0x114   :  { %v5357_v21 = vsub.f32 %v1407_v52, %v1443_v25 }
 0x115   :  { %4295 = vmatpush3.bf16.msra.mxu1 %v5114_v60  ;;  %v1446_v60 = vand.u32 4294901760, %v1408_v23 }
 0x116   :  { %4296 = vmatprep.subr.bf16.mxu1 %v4656_v0 }
 0x117   :  { %v5316_v62 = vpack.c.bf16 %v1446_v60, %v1443_v25 }
 0x119   :  { %4298 = vmatpush3.bf16.msra.mxu1 %v5135_v42  ;;  %v1410_v42 = vld [vmem:[#allocation7 + $0x48] sm:$0xff] }
 0x11a   :  { %4299 = vmatprep.subr.bf16.mxu1 %v4656_v0  ;;  %v1452_v10 = vand.u32 4294901760, %v1410_v42 }
 0x11c   :  { %3728 = vmatmul.mubr.f32.vlgmr.msra.gmra.mrb[2].mxu1 %v4812_v47 }
 0x11d   :  { %4301 = vmatpush3.bf16.msra.mxu1 %v4966_v6  ;;  %3762 = vmatprep.mubr.msk.f32.mxu1 %vm4657_vm0, %v5634_v31  ;;  %v3012_v6 = vld [vmem:[%s5598_s2] ss:$0 sm:$0xff] }
 0x11e   :  { %4302 = vmatprep.subr.bf16.mxu1 %v4656_v0 }
 0x121   :  { %4304 = vmatpush3.bf16.msra.mxu1 %v4991_v57  ;;  %v1401_v57 = vld [vmem:[#allocation7] sm:$0xff] }
 0x122   :  { %4305 = vmatprep.subr.bf16.mxu1 %v4656_v0 }
 0x125   :  { %4307 = vmatpush3.bf16.msra.mxu1 %v5017_v17  ;;  %v1425_v17 = vand.u32 4294901760, %v1401_v57 }
 0x126   :  { %4308 = vmatprep.subr.bf16.mxu1 %v4656_v0 }
 0x127   :  { %v5304_v9 = vpack.c.bf16 %v1428_v8, %v1425_v17  ;;  %v5329_v36 = vsub.f32 %v1401_v57, %v1425_v17  ;;  %v1527_v57 = vand.u32 4294901760, %v1526_v54  ;;  %v5396_v54 = vsub.f32 %v5324_v51, %v1464_v30 }
 0x129   :  { %4310 = vmatpush3.bf16.msra.mxu1 %v5038_v41  ;;  %4325 = vmatpush3.bf16.msra.mxu0 %v5304_v9  ;;  %v1404_v41 = vld [vmem:[#allocation7 + $0x18] sm:$0xff]  ;;  %v1518_v48 = vand.u32 4294901760, %v5329_v36  ;;  %v1609_v30 = vand.u32 4294901760, %v5396_v54 }
 0x12a   :  { %4311 = vmatprep.subr.bf16.mxu1 %v4656_v0  ;;  %4326 = vmatprep.subr.bf16.mxu0 %v4656_v0  ;;  %v1434_v58 = vand.u32 4294901760, %v1404_v41 }
 0x12b   :  { %v1519_v12 = vsub.f32 %v5329_v36, %v1518_v48  ;;  %v5415_v40 = vpack.c.bf16 %v1525_v59, %v1518_v48 }
 0x12c   :  { %v5308_v46 = vpack.c.bf16 %v1434_v58, %v1431_v19  ;;  %v5339_v33 = vsub.f32 %v1404_v41, %v1434_v58 }
 0x12d   :  { %4313 = vmatpush3.bf16.msra.mxu1 %v5059_v44  ;;  %v1405_v44 = vld [vmem:[#allocation7 + $0x20] sm:$0xff] }
 0x12e   :  { %4314 = vmatprep.subr.bf16.mxu1 %v4656_v0  ;;  %v1437_v18 = vand.u32 4294901760, %v1405_v44  ;;  %4328 = vmatpush3.bf16.msra.mxu0 %v5308_v46 }
 0x12f   :  { %4329 = vmatprep.subr.bf16.mxu0 %v4656_v0 }
 0x130   :  { %v5350_v37 = vsub.f32 %v1405_v44, %v1437_v18 }
 0x131   :  { %4316 = vmatpush3.bf16.msra.mxu1 %v5080_v20  ;;  %v5312_v20 = vpack.c.bf16 %v1440_v7, %v1437_v18  ;;  %v1560_v18 = vand.u32 4294901760, %v5357_v21 }
 0x132   :  { %4317 = vmatprep.subr.bf16.mxu1 %v4656_v0  ;;  %v1546_v44 = vand.u32 4294901760, %v5350_v37 }
 0x133   :  { %4331 = vmatpush3.bf16.msra.mxu0 %v5312_v20 }
 0x134   :  { %4332 = vmatprep.subr.bf16.mxu0 %v4656_v0  ;;  %v1547_v25 = vsub.f32 %v5350_v37, %v1546_v44 }
 0x135   :  { %4319 = vmatpush3.bf16.msra.mxu1 %v5101_v15 }
 0x136   :  { %4320 = vmatprep.subr.bf16.mxu1 %v4656_v0  ;;  %v1548_v16 = vand.u32 4294901760, %v1547_v25  ;;  %v1602_v25 = vand.u32 4294901760, %v5392_v22 }
 0x137   :  { %4334 = vmatpush3.bf16.msra.mxu0 %v5316_v62 }
 0x138   :  { %4335 = vmatprep.subr.bf16.mxu0 %v4656_v0 }
 0x139   :  { %4322 = vmatpush3.bf16.msra.mxu1 %v5121_v2  ;;  %v1409_v2 = vld [vmem:[#allocation7 + $0x40] sm:$0xff] }
 0x13a   :  { %3975 = vmatprep.subr.mxu1 %v5634_v31  ;;  %v1449_v1 = vand.u32 4294901760, %v1409_v2 }
 0x13c   :  { %3763 = vmatmul.mubr.f32.vlgmr.msra.gmra.mrb[2].mxu1 %v4812_v47  ;;  %v5320_v27 = vpack.c.bf16 %v1452_v10, %v1449_v1 }
 0x13d   :  { %3977 = vmatprep.mubr.msk.f32.mxu1 %vm4657_vm0, %v5634_v31 }
 0x13e   :  { %4337 = vmatpush3.bf16.msra.mxu0 %v5320_v27 }
 0x13f   :  { %4338 = vmatprep.subr.bf16.mxu0 %v4656_v0 }
 0x142   :  { %4340 = vmatpush3.bf16.msra.mxu0 %v5326_v53 }
 0x143   :  { %4341 = vmatprep.subr.bf16.mxu0 %v4656_v0 }
 0x146   :  { %4343 = vmatpush3.bf16.msra.mxu0 %v5335_v55 }
 0x147   :  { %4344 = vmatprep.subr.bf16.mxu0 %v4656_v0 }
 0x14a   :  { %4346 = vmatpush3.bf16.msra.mxu0 %v5345_v3 }
 0x14b   :  { %4347 = vmatprep.subr.bf16.mxu0 %v4656_v0 }
 0x14d   :  { %3798 = vmatmul.mubr.f32.vlgmr.msra.gmra.mrb[2].mxu0 %v4880_v29 }
 0x14e   :  { %3832 = vmatprep.mubr.msk.f32.mxu0 %vm4657_vm0, %v5634_v31 }
 0x14f   :  { %v333_v28 = vpop.f32.mrb[0].mxu1 }
 0x150   :  { %v3414_v61 = vpop.f32.mrb[1].mxu1  ;;  %v4467_v24 = vadd.f32 %v3012_v6, %v333_v28  ;;  %v1520_v28 = vand.u32 4294901760, %v1519_v12  ;;  %v1539_v6 = vand.u32 4294901760, %v5339_v33  ;;  %v1595_v12 = vand.u32 4294901760, %v5373_v13 }
 0x151   :  { %v1532_v61 = vand.u32 4294901760, %v5337_v45 }
 0x152   :  { %v1540_v8 = vsub.f32 %v5339_v33, %v1539_v6  ;;  %v4348_v41 = vpack.c.bf16 %v1527_v57, %v1520_v28 }
 0x153   :  { %v1533_v17 = vsub.f32 %v5337_v45, %v1532_v61 }
 0x154   :  { %v1541_v58 = vand.u32 4294901760, %v1540_v8  ;;  %4349 = vmatpush3.bf16.msra.mxu0 %v4348_v41  ;;  %v5399_v8 = vsub.f32 %v1415_v38, %v1467_v34 }
 0x155   :  { %v1534_v19 = vand.u32 4294901760, %v1533_v17  ;;  %4350 = vmatprep.subr.bf16.mxu0 %v4656_v0 }
 0x156   :  { %v1616_v38 = vand.u32 4294901760, %v5399_v8 }
 0x157   :  { %v4351_v29 = vpack.c.bf16 %v1541_v58, %v1534_v19  ;;  %v1596_v58 = vsub.f32 %v5373_v13, %v1595_v12 }
 0x158   :  { %v1617_v48 = vsub.f32 %v5399_v8, %v1616_v38 }
 0x159   :  { %4352 = vmatpush3.bf16.msra.mxu0 %v4351_v29  ;;  %v1597_v34 = vand.u32 4294901760, %v1596_v58 }
 0x15a   :  { %4353 = vmatprep.subr.bf16.mxu0 %v4656_v0 }
 0x191   :  { %v732_v26 = vpop.f32.mrb[0].mxu0 }
 0x192   :  { %v5302_v32 = vadd.f32 %v4467_v24, %v732_v26  ;;  %v3554_v15 = vpop.f32.mrb[1].mxu0  ;;  %v5362_v24 = vsub.f32 %v1408_v23, %v1446_v60  ;;  %v5364_v26 = vsub.f32 %v1409_v2, %v1449_v1  ;;  %v1554_v60 = vsub.f32 %v5352_v39, %v1553_v35 }
 0x193   :  { %v5366_v15 = vsub.f32 %v1410_v42, %v1452_v10  ;;  %v1588_v2 = vand.u32 4294901760, %v5369_v50  ;;  %v1561_v42 = vsub.f32 %v5357_v21, %v1560_v18 }
 0x194   :  { %v1567_v7 = vand.u32 4294901760, %v5362_v24  ;;  %v1574_v52 = vand.u32 4294901760, %v5364_v26  ;;  %v1555_v43 = vand.u32 4294901760, %v1554_v60 }
 0x195   :  { %v1581_v23 = vand.u32 4294901760, %v5366_v15  ;;  %v1562_v28 = vand.u32 4294901760, %v1561_v42  ;;  %v1589_v5 = vsub.f32 %v5369_v50, %v1588_v2  ;;  %v1603_v42 = vsub.f32 %v5392_v22, %v1602_v25 }
 0x196   :  { %v1568_v1 = vsub.f32 %v5362_v24, %v1567_v7  ;;  %v1575_v10 = vsub.f32 %v5364_v26, %v1574_v52  ;;  %v4354_v17 = vpack.c.bf16 %v1555_v43, %v1548_v16  ;;  %v5422_v16 = vpack.c.bf16 %v1567_v7, %v1560_v18 }
 0x197   :  { %v1582_v11 = vsub.f32 %v5366_v15, %v1581_v23  ;;  %v1590_v60 = vand.u32 4294901760, %v1589_v5  ;;  %v5425_v43 = vpack.c.bf16 %v1581_v23, %v1574_v52  ;;  %v1618_v18 = vand.u32 4294901760, %v1617_v48 }
 0x198   :  { %v1569_v57 = vand.u32 4294901760, %v1568_v1  ;;  %v1576_v41 = vand.u32 4294901760, %v1575_v10  ;;  %4355 = vmatpush3.bf16.msra.mxu0 %v4354_v17  ;;  %v1610_v1 = vsub.f32 %v5396_v54, %v1609_v30  ;;  %v5418_v10 = vpack.c.bf16 %v1539_v6, %v1532_v61 }
 0x199   :  { %v1583_v19 = vand.u32 4294901760, %v1582_v11  ;;  %4356 = vmatprep.subr.bf16.mxu0 %v4656_v0  ;;  %v5420_v11 = vpack.c.bf16 %v1553_v35, %v1546_v44  ;;  %v5431_v17 = vpack.c.bf16 %v1623_v14, %v1616_v38  ;;  %v4363_v59 = vpack.c.bf16 %v1597_v34, %v1590_v60 }
 0x19a   :  { %v4357_v51 = vpack.c.bf16 %v1569_v57, %v1562_v28  ;;  %v5427_v28 = vpack.c.bf16 %v1595_v12, %v1588_v2  ;;  %v5429_v57 = vpack.c.bf16 %v1609_v30, %v1602_v25  ;;  %v1604_v61 = vand.u32 4294901760, %v1603_v42 }
 0x19b   :  { %v4360_v29 = vpack.c.bf16 %v1583_v19, %v1576_v41  ;;  %v1611_v6 = vand.u32 4294901760, %v1610_v1  ;;  %v1624_v44 = vsub.f32 %v5402_v63, %v1623_v14  ;;  %v4372_v23 = vpack.c.bf16 %v5331_v49, %v5329_v36 }
 0x19c   :  { %4358 = vmatpush3.bf16.msra.mxu0 %v4357_v51  ;;  %v4375_v2 = vpack.c.bf16 %v5339_v33, %v5337_v45  ;;  %v4378_v12 = vpack.c.bf16 %v5352_v39, %v5350_v37  ;;  %v4381_v36 = vpack.c.bf16 %v5362_v24, %v5357_v21  ;;  %v4384_v49 = vpack.c.bf16 %v5366_v15, %v5364_v26 }
 0x19d   :  { %4359 = vmatprep.subr.bf16.mxu0 %v4656_v0  ;;  %v4366_v35 = vpack.c.bf16 %v1611_v6, %v1604_v61  ;;  %v1625_v7 = vand.u32 4294901760, %v1624_v44  ;;  %v4387_v45 = vpack.c.bf16 %v5373_v13, %v5369_v50  ;;  %v4390_v33 = vpack.c.bf16 %v5396_v54, %v5392_v22 }
 0x19e   :  { %v4393_v37 = vpack.c.bf16 %v5402_v63, %v5399_v8  ;;  %v736_v39 = vmul.f32 0.35355338, %v5302_v32  ;;  %v3013_v32 = vld [vmem:[%s5600_s4] ss:$0 sm:$0xff] }
 0x19f   :  { %v4369_v52 = vpack.c.bf16 %v1625_v7, %v1618_v18 }
 0x1a0   :  { %4361 = vmatpush3.bf16.msra.mxu0 %v4360_v29  ;;  %v5473_v21 = vand.u32 4294901760, %v736_v39 }
 0x1a1   :  { %4362 = vmatprep.subr.bf16.mxu0 %v4656_v0 }
 0x1a2   :  { %v2135_v24 = vsub.f32 %v736_v39, %v5473_v21 }
 0x1a4   :  { %4364 = vmatpush3.bf16.msra.mxu0 %v4363_v59 }
 0x1a5   :  { %4365 = vmatprep.subr.bf16.mxu0 %v4656_v0 }
 0x1a8   :  { %4367 = vmatpush3.bf16.msra.mxu0 %v4366_v35 }
 0x1a9   :  { %4368 = vmatprep.subr.bf16.mxu0 %v4656_v0 }
 0x1ac   :  { %4370 = vmatpush3.bf16.msra.mxu0 %v4369_v52 }
 0x1ad   :  { %4371 = vmatprep.subr.bf16.mxu0 %v4656_v0 }
 0x1af   :  { %3833 = vmatmul.mubr.f32.vlgmr.msra.gmra.mrb[2].mxu0 %v4812_v47 }
 0x1b0   :  { %4373 = vmatpush3.bf16.msra.mxu0 %v4372_v23  ;;  %3867 = vmatprep.mubr.msk.f32.mxu0 %vm4657_vm0, %v5634_v31 }
 0x1b1   :  { %4374 = vmatprep.subr.bf16.mxu0 %v4656_v0 }
 0x1b4   :  { %4376 = vmatpush3.bf16.msra.mxu0 %v4375_v2 }
 0x1b5   :  { %4377 = vmatprep.subr.bf16.mxu0 %v4656_v0 }
 0x1b8   :  { %4379 = vmatpush3.bf16.msra.mxu0 %v4378_v12 }
 0x1b9   :  { %4380 = vmatprep.subr.bf16.mxu0 %v4656_v0 }
 0x1bc   :  { %4382 = vmatpush3.bf16.msra.mxu0 %v4381_v36 }
 0x1bd   :  { %4383 = vmatprep.subr.bf16.mxu0 %v4656_v0 }
 0x1c0   :  { %4385 = vmatpush3.bf16.msra.mxu0 %v4384_v49 }
 0x1c1   :  { %4386 = vmatprep.subr.bf16.mxu0 %v4656_v0 }
 0x1c4   :  { %4388 = vmatpush3.bf16.msra.mxu0 %v4387_v45 }
 0x1c5   :  { %4389 = vmatprep.subr.bf16.mxu0 %v4656_v0 }
 0x1c8   :  { %4391 = vmatpush3.bf16.msra.mxu0 %v4390_v33 }
 0x1c9   :  { %4392 = vmatprep.subr.bf16.mxu0 %v4656_v0 }
 0x1cc   :  { %4394 = vmatpush3.bf16.msra.mxu0 %v4393_v37 }
 0x1cd   :  { %4395 = vmatprep.subr.bf16.mxu0 %v4656_v0 }
 0x1cf   :  { %3868 = vmatmul.mubr.f32.vlgmr.msra.gmra.mrb[2].mxu0 %v4826_v56  ;;  %v2136_v56 = vand.u32 4294901760, %v2135_v24 }
 0x1d0   :  { %4397 = vmatpush3.bf16.msra.mxu0 %v5304_v9  ;;  %3902 = vmatprep.mubr.msk.f32.mxu0 %vm4657_vm0, %v5634_v31 }
 0x1d1   :  { %4398 = vmatprep.subr.bf16.mxu0 %v4656_v0  ;;  %v2137_v13 = vsub.f32 %v2135_v24, %v2136_v56 }
 0x1d3   :  { %v2138_v8 = vand.u32 4294901760, %v2137_v13 }
 0x1d4   :  { %4400 = vmatpush3.bf16.msra.mxu0 %v5308_v46 }
 0x1d5   :  { %4401 = vmatprep.subr.bf16.mxu0 %v4656_v0 }
 0x1d8   :  { %4403 = vmatpush3.bf16.msra.mxu0 %v5312_v20 }
 0x1d9   :  { %4404 = vmatprep.subr.bf16.mxu0 %v4656_v0 }
 0x1dc   :  { %4406 = vmatpush3.bf16.msra.mxu0 %v5316_v62 }
 0x1dd   :  { %4407 = vmatprep.subr.bf16.mxu0 %v4656_v0 }
 0x1e0   :  { %4409 = vmatpush3.bf16.msra.mxu0 %v5320_v27 }
 0x1e1   :  { %4410 = vmatprep.subr.bf16.mxu0 %v4656_v0 }
 0x1e4   :  { %4412 = vmatpush3.bf16.msra.mxu0 %v5326_v53 }
 0x1e5   :  { %4413 = vmatprep.subr.bf16.mxu0 %v4656_v0 }
 0x1e8   :  { %4415 = vmatpush3.bf16.msra.mxu0 %v5335_v55 }
 0x1e9   :  { %4416 = vmatprep.subr.bf16.mxu0 %v4656_v0 }
 0x1ec   :  { %4418 = vmatpush3.bf16.msra.mxu0 %v5345_v3 }
 0x1ed   :  { %4419 = vmatprep.subr.bf16.mxu0 %v4656_v0 }
 0x1ef   :  { %3903 = vmatmul.mubr.f32.vlgmr.msra.gmra.mrb[2].mxu0 %v4844_v4  ;;  %v2065_v4 = vlaneseq }
 0x1f0   :  { %4421 = vmatpush3.bf16.msra.mxu0 %v5415_v40  ;;  %3937 = vmatprep.mubr.msk.f32.mxu0 %vm4657_vm0, %v5634_v31 }
 0x1f1   :  { %4422 = vmatprep.subr.bf16.mxu0 %v4656_v0 }
 0x1f4   :  { %4424 = vmatpush3.bf16.msra.mxu0 %v5418_v10 }
 0x1f5   :  { %4425 = vmatprep.subr.bf16.mxu0 %v4656_v0 }
 0x1f8   :  { %4427 = vmatpush3.bf16.msra.mxu0 %v5420_v11 }
 0x1f9   :  { %4428 = vmatprep.subr.bf16.mxu0 %v4656_v0 }
 0x1fc   :  { %4430 = vmatpush3.bf16.msra.mxu0 %v5422_v16 }
 0x1fd   :  { %4431 = vmatprep.subr.bf16.mxu0 %v4656_v0 }
 0x200   :  { %4433 = vmatpush3.bf16.msra.mxu0 %v5425_v43 }
 0x201   :  { %4434 = vmatprep.subr.bf16.mxu0 %v4656_v0 }
 0x204   :  { %4436 = vmatpush3.bf16.msra.mxu0 %v5427_v28 }
 0x205   :  { %4437 = vmatprep.subr.bf16.mxu0 %v4656_v0 }
 0x208   :  { %4439 = vmatpush3.bf16.msra.mxu0 %v5429_v57 }
 0x209   :  { %4440 = vmatprep.subr.bf16.mxu0 %v4656_v0 }
 0x20c   :  { %4442 = vmatpush3.bf16.msra.mxu0 %v5431_v17 }
 0x20d   :  { %4443 = vmatprep.subr.bf16.mxu0 %v4656_v0 }
 0x20f   :  { %v1397_v26 = vpop.f32.mrb[2].mxu1  ;;  %3938 = vmatmul.mubr.f32.vlgmr.msra.gmra.mrb[2].mxu0 %v4812_v47 }
 0x210   :  { %v4469_v15 = vadd.f32 %v3013_v32, %v1397_v26  ;;  %v3764_v50 = vpop.f32.mrb[3].mxu1  ;;  %4445 = vmatpush3.bf16.msra.mxu0 %v5304_v9  ;;  %3972 = vmatprep.mubr.msk.f32.mxu0 %vm4657_vm0, %v5634_v31  ;;  %v2066_v9 = vand.u32 127, %v2065_v4 }
 0x211   :  { %4446 = vmatprep.subr.bf16.mxu0 %v4656_v0 }
 0x212   :  { %v2069_v22 = vand.u32 4294901760, %v4469_v15  ;;  %vm2067_vm1 = vcmp.lt.s32.totalorder %v2066_v9, 4 }
 0x214   :  { %v2146_v54 = vsub.f32 %v4469_v15, %v2069_v22  ;;  %3976 = vmatpush3.xpose.msra.mxu1 %v2069_v22  ;;  %4448 = vmatpush3.bf16.msra.mxu0 %v5308_v46 }
 0x215   :  { %3980 = vmatprep.subr.mxu1 %v5634_v31  ;;  %4449 = vmatprep.subr.bf16.mxu0 %v4656_v0 }
 0x216   :  { %v2147_v41 = vand.u32 4294901760, %v2146_v54 }
 0x217   :  { %3978 = vmatmul.mubr.f32.vlgmr.msra.gmra.mrb[4].mxu1 %v2138_v8 }
 0x218   :  { %v2148_v19 = vsub.f32 %v2146_v54, %v2147_v41  ;;  %3982 = vmatprep.mubr.msk.f32.mxu1 %vm4657_vm0, %v5634_v31  ;;  %4451 = vmatpush3.bf16.msra.mxu0 %v5312_v20 }
 0x219   :  { %4452 = vmatprep.subr.bf16.mxu0 %v4656_v0 }
 0x21a   :  { %v2149_v5 = vand.u32 4294901760, %v2148_v19 }
 0x21c   :  { %3981 = vmatpush3.xpose.msra.mxu1 %v2149_v5  ;;  %4454 = vmatpush3.bf16.msra.mxu0 %v5316_v62 }
 0x21d   :  { %3985 = vmatprep.subr.mxu1 %v5634_v31  ;;  %4455 = vmatprep.subr.bf16.mxu0 %v4656_v0 }
 0x21f   :  { %3983 = vmatmul.mubr.f32.vlgmr.msra.gmra.mrb[4].mxu1 %v5473_v21 }
 0x220   :  { %3986 = vmatpush3.xpose.msra.mxu1 %v2146_v54  ;;  %3987 = vmatprep.mubr.msk.f32.mxu1 %vm4657_vm0, %v5634_v31 }
 0x221   :  { %3990 = vmatprep.subr.mxu1 %v5634_v31  ;;  %4457 = vmatpush3.bf16.msra.mxu0 %v5320_v27 }
 0x222   :  { %4458 = vmatprep.subr.bf16.mxu0 %v4656_v0 }
 0x225   :  { %4460 = vmatpush3.bf16.msra.mxu0 %v5326_v53  ;;  %v3014_v53 = vld [vmem:[%s5602_s6] ss:$0 sm:$0xff]  ;;  %s4659_s6 = smov [#allocation9]  }
 0x226   :  { %4461 = vmatprep.subr.bf16.mxu0 %v4656_v0  ;;  %s2998_s23 = sshll.u32 %s4659_s6, 4  ;;  %s2999_s23 = int_to_ptr.vmem [resolvable:$true] %s2998_s23 }
 0x227   :  { %3988 = vmatmul.mubr.f32.vlgmr.msra.gmra.mrb[4].mxu1 %v2135_v24  ;;  %s4599_s24 = scalar_lea.vmem %s2999_s23, 64  ;;  %p4604_p11 = scmp.lt.s32.totalorder %s2999_s23, %s2999_s23 }
 0x228   :  { %3991 = vmatpush3.xpose.msra.mxu1 %v2069_v22  ;;  %3992 = vmatprep.mubr.msk.f32.mxu1 %vm4657_vm0, %v5634_v31  ;;  %p4600_p10 = scmp.ne.s32.totalorder %s2999_s23, %s4599_s24  ;;  %p4605_p12 = scmp.lt.s32.totalorder %s4599_s24, %s4599_s24 }
 0x229   :  { %3995 = vmatprep.subr.mxu1 %v5634_v31  ;;  %4463 = vmatpush3.bf16.msra.mxu0 %v5335_v55 }
 0x22a   :  { %4464 = vmatprep.subr.bf16.mxu0 %v4656_v0  ;;  %p4606_p13 = por %p4605_p12, %p4604_p11 }
 0x22c   :  { %p4607_p0 = pnand %p4606_p13, %p4600_p10 }
 0x22d   :  { %4466 = vmatpush3.bf16.msra.mxu0 %v5345_v3 }
 0x22f   :  { %3993 = vmatmul.mubr.f32.vlgmr.msra.gmra.mrb[4].mxu1 %v2136_v56 }
 0x230   :  { %3996 = vmatpush3.xpose.msra.mxu1 %v2147_v41  ;;  %3997 = vmatprep.mubr.msk.f32.mxu1 %vm4657_vm0, %v5634_v31 }
 0x231   :  { %4000 = vmatprep.subr.mxu1 %v5634_v31  ;;  %3973 = vmatmul.mubr.f32.vlgmr.msra.gmra.mrb[2].mxu0 %v4812_v47 }
 0x237   :  { %3998 = vmatmul.mubr.f32.vlgmr.msra.gmra.mrb[4].mxu1 %v5473_v21 }
 0x238   :  { %4001 = vmatpush3.xpose.msra.mxu1 %v2069_v22  ;;  %4002 = vmatprep.mubr.msk.f32.mxu1 %vm4657_vm0, %v5634_v31 }
 0x239   :  { %4005 = vmatprep.subr.mxu1 %v5634_v31 }
 0x23f   :  { %4003 = vmatmul.mubr.f32.vlgmr.msra.gmra.mrb[4].mxu1 %v5473_v21 }
 0x240   :  { %4007 = vmatprep.mubr.msk.f32.mxu1 %vm4657_vm0, %v5634_v31 }
 0x304   :  { %v2061_v55 = vpop.f32.mrb[2].mxu0 }
 0x305   :  { %v4470_v0 = vadd.f32 %v3014_v53, %v2061_v55  ;;  %v3974_v63 = vpop.f32.mrb[3].mxu0 }
 0x307   :  { %v2533_v3 = vand.u32 4294901760, %v4470_v0 }
 0x309   :  { %4006 = vmatpush3.msra.mxu1 %v2533_v3  ;;  %v2610_v38 = vsub.f32 %v4470_v0, %v2533_v3 }
 0x30a   :  { %4010 = vmatprep.subr.mxu1 %v5634_v31 }
 0x30b   :  { %v2611_v40 = vand.u32 4294901760, %v2610_v38 }
 0x30d   :  { %v2612_v11 = vsub.f32 %v2610_v38, %v2611_v40 }
 0x30f   :  { %v2613_v28 = vand.u32 4294901760, %v2612_v11 }
 0x312   :  { %v2510_v46 = vpop.f32.mrb[4].mxu1 }
 0x313   :  { %v2516_v20 = vsel %vm2067_vm1, %v2510_v46, -1e+30  ;;  %v4004_v62 = vpop.f32.mrb[5].mxu1 }
 0x314   :  { %v2518_v27 = vsel %vm2517_vm2, %v2516_v20, -inf }
 0x315   :  { %2519 = vmax.xlane.f32.xlu0 %v2518_v27 }
 0x3a2   :  { %v2520_v47 = vpop.xlane.xlu0 %2519 }
 0x3a3   :  { %v2521_v58 = vsub.f32 %v2516_v20, %v2520_v47 }
 0x3a5   :  { %v2522_v25 = vmul.f32 1.442695, %v2521_v58 }
 0x3a7   :  { %4529 = vpow2.f32 %v2522_v25 }
 0x3b1   :  { %v4530_v51 = vpop.eup %4529 }
 0x3b2   :  { %v2524_v30 = vsel %vm2517_vm2, %v4530_v51, 0.0 }
 0x3b3   :  { %2525 = vadd.xlane.f32.xlu0 %v2524_v30 }
 0x440   :  { %v2526_v29 = vpop.xlane.xlu0 %2525 }
 0x441   :  { %4531 = vrcp.f32 %v2526_v29 }
 0x44b   :  { %v4532_v60 = vpop.eup %4531 }
 0x44c   :  { %v2528_v34 = vmul.f32 %v4532_v60, %v4530_v51 }
 0x44e   :  { %v2530_v42 = vsel %vm2517_vm2, %v2528_v34, 0  ;;  %2981 = vst.msk [vmem:[#allocation9] sm:$0xf] %vm2980_vm3, %v2528_v34 }
 0x44f   :  { %v2598_v14 = vand.u32 4294901760, %v2530_v42 }
 0x451   :  { %v2599_v1 = vsub.f32 %v2530_v42, %v2598_v14 }
 0x453   :  { %v2600_v10 = vand.u32 4294901760, %v2599_v1 }
 0x455   :  { %v2601_v16 = vsub.f32 %v2599_v1, %v2600_v10 }
 0x457   :  { %v2602_v43 = vand.u32 4294901760, %v2601_v16 }
 0x459   :  { %4008 = vmatmul.mubr.f32.vlgmr.msra.gmra.mrb[6].mxu1 %v2602_v43 }
 0x45a   :  { %4011 = vmatpush3.msra.mxu1 %v2613_v28  ;;  %4012 = vmatprep.mubr.msk.f32.mxu1 %vm4657_vm0, %v5634_v31 }
 0x45b   :  { %4015 = vmatprep.subr.mxu1 %v5634_v31 }
 0x461   :  { %4013 = vmatmul.mubr.f32.vlgmr.msra.gmra.mrb[6].mxu1 %v2598_v14 }
 0x462   :  { %4016 = vmatpush3.msra.mxu1 %v2610_v38  ;;  %4017 = vmatprep.mubr.msk.f32.mxu1 %vm4657_vm0, %v5634_v31 }
 0x463   :  { %4020 = vmatprep.subr.mxu1 %v5634_v31 }
 0x469   :  { %4018 = vmatmul.mubr.f32.vlgmr.msra.gmra.mrb[6].mxu1 %v2599_v1 }
 0x46a   :  { %4021 = vmatpush3.msra.mxu1 %v2533_v3  ;;  %4022 = vmatprep.mubr.msk.f32.mxu1 %vm4657_vm0, %v5634_v31 }
 0x46b   :  { %4025 = vmatprep.subr.mxu1 %v5634_v31 }
 0x471   :  { %4023 = vmatmul.mubr.f32.vlgmr.msra.gmra.mrb[6].mxu1 %v2600_v10 }
 0x472   :  { %4026 = vmatpush3.msra.mxu1 %v2611_v40  ;;  %4027 = vmatprep.mubr.msk.f32.mxu1 %vm4657_vm0, %v5634_v31 }
 0x473   :  { %4030 = vmatprep.subr.mxu1 %v5634_v31 }
 0x479   :  { %4028 = vmatmul.mubr.f32.vlgmr.msra.gmra.mrb[6].mxu1 %v2598_v14 }
 0x47a   :  { %4031 = vmatpush3.msra.mxu1 %v2533_v3  ;;  %4032 = vmatprep.mubr.msk.f32.mxu1 %vm4657_vm0, %v5634_v31 }
 0x481   :  { %4033 = vmatmul.mubr.f32.vlgmr.msra.gmra.mrb[6].mxu1 %v2598_v14 }
 0x482   :  { %4610 = shalt.err (!%p4607_p0)
}
 0x483   :  { %s4611_s27 = scalar_lea.hbm %s5604_s8, 64 }
 0x484   :  { %p4612_p1 = scmp.ne.s32.totalorder %s5604_s8, %s4611_s27  ;;  %p4615_p2 = scmp.lt.u32.totalorder %s4611_s27, %s5604_s8 }
 0x486   :  { %p4617_p3 = pnand %p4615_p2, %p4612_p1 }
 0x488   :  { %4620 = shalt.err (!%p4617_p3)
}
 0x489   :  { %3001 = dma.vmem_to_hbm [thread:$0]  %s2999_s23, 64, %s5604_s8, [#allocation10]   ;;  %vm2978_vm4 = vcmask 60416  }
 0x48a   :  { %s4660_s12 = smov [#allocation8]  }
 0x48b   :  { %s2988_s13 = sshll.u32 %s4660_s12, 4  ;;  %s2989_s13 = int_to_ptr.vmem [resolvable:$true] %s2988_s13 }
 0x48c   :  { %s4621_s14 = scalar_lea.vmem %s2989_s13, 64  ;;  %p4626_p5 = scmp.lt.s32.totalorder %s2989_s13, %s2989_s13 }
 0x48d   :  { %p4622_p4 = scmp.ne.s32.totalorder %s2989_s13, %s4621_s14  ;;  %p4627_p6 = scmp.lt.s32.totalorder %s4621_s14, %s4621_s14 }
 0x48f   :  { %p4628_p7 = por %p4627_p6, %p4626_p5 }
 0x491   :  { %p4629_p8 = pnand %p4628_p7, %p4622_p4 }
 0x554   :  { %v2974_v31 = vpop.f32.mrb[6].mxu1 }
 0x555   :  { %v4034_v57 = vpop.f32.mrb[7].mxu1  ;;  %2979 = vst.msk [vmem:[#allocation8] sm:$0xf] %vm2978_vm4, %v2974_v31 }
 0x556   :  { %4632 = shalt.err (!%p4629_p8)
}
 0x557   :  { %s4633_s19 = scalar_lea.hbm %s5603_s7, 64 }
 0x558   :  { %p4634_p9 = scmp.ne.s32.totalorder %s5603_s7, %s4633_s19  ;;  %p4637_p10 = scmp.lt.u32.totalorder %s4633_s19, %s5603_s7 }
 0x55a   :  { %p4639_p11 = pnand %p4637_p10, %p4634_p9 }
 0x55c   :  { %4642 = shalt.err (!%p4639_p11)
}
 0x55d   :  { %2991 = dma.vmem_to_hbm [thread:$0]  %s2989_s13, 64, %s5603_s7, [#allocation4]  }
 0x55e   :  { %4647 = dma.done.wait [#allocation4], 64  }
 0x55f   :  { %4648 = vsyncadd [#allocation4], 4294967232 }
 0x560   :  { %4649 = dma.done.wait [#allocation10], 64  }
 0x561   :  { %4650 = vsyncadd [#allocation10], 4294967232 }
 0x562   :  { %3008 = vsyncpa [#allocation3], 1 }
 0x563   :  { %3009 = vsyncpa [#allocation6], 1 }
 0x564   :  { %3010 = vsyncpa [#allocation4], 1 }
 0x565   :  { %3011 = vsyncpa [#allocation10], 1 }

</bundles_post_ra>
